<compile_context>
chip_gen: v7x
topology: tpu7x:2x2x1
jax: 0.10.0
libtpu: 0.0.40
codegen_flags: <defaults>
</compile_context>

<pallas_src>
import functools

import jax
import jax.numpy as jnp
from jax.experimental import pallas as pl
from jax.experimental.pallas import tpu as pltpu

LANE = 128
VMEM_LIMIT = 48 * 1024 * 1024  # fits v7x's 64 MiB physical VMEM


def _round_up(x, m):
    return ((x + m - 1) // m) * m


# ----------------------------- Pallas kernels -----------------------------

def _conv_pool_relu_kernel(cols_ref, w_ref, b_ref, o_ref):
    """Fused conv (as matmul) + bias + 2x2 max-pool + ReLU over an M-tile.

    cols_ref: (4, tile_m, K) bf16  im2col patches; leading axis = the 4
                                   positions inside each 2x2 pooling window.
    w_ref:    (K, 128) bf16        conv weight, output channels padded to 128.
    b_ref:    (1, 128) f32         bias, padded to 128.
    o_ref:    (tile_m, 128) bf16   pooled + ReLU'd feature rows (channels-last).
    """
    p4, tm, k = cols_ref.shape
    # One tall MXU push instead of 4 small ones (leading-dim collapse only;
    # tile_m is a multiple of 16 so this is a tile-aligned relabel).
    c = cols_ref[...].reshape(p4 * tm, k)
    acc = jnp.dot(c, w_ref[...], preferred_element_type=jnp.float32)
    acc = acc.reshape(p4, tm, LANE)
    pooled = jnp.max(acc, axis=0)                 # 2x2 max-pool on the VPU
    # max_p(dot_p) + b == max_p(dot_p + b)  (bias constant over the window)
    o_ref[...] = jnp.maximum(pooled + b_ref[...], 0.0).astype(o_ref.dtype)


def conv_pool_relu(cols, w_pad, b_pad, *, target_rows):
    """cols: (4, M, K) bf16 -> (M, 128) bf16 pooled feature rows."""
    _, m, k = cols.shape
    tile_m = min(target_rows, _round_up(m, 16))   # 16: bf16 sublane packing
    m_pad = _round_up(m, tile_m)
    cols = jnp.pad(cols, ((0, 0), (0, m_pad - m), (0, 0)))
    flops = 2 * 4 * m_pad * k * LANE
    bytes_acc = (cols.size * 2 + w_pad.size * 2 + b_pad.size * 4
                 + m_pad * LANE * 2)
    out = pl.pallas_call(
        _conv_pool_relu_kernel,
        out_shape=jax.ShapeDtypeStruct((m_pad, LANE), jnp.bfloat16),
        grid=(m_pad // tile_m,),
        in_specs=[
            pl.BlockSpec((4, tile_m, k), lambda i: (0, i, 0)),
            pl.BlockSpec((k, LANE), lambda i: (0, 0)),
            pl.BlockSpec((1, LANE), lambda i: (0, 0)),
        ],
        out_specs=pl.BlockSpec((tile_m, LANE), lambda i: (i, 0)),
        compiler_params=pltpu.CompilerParams(
            dimension_semantics=("parallel",),
            vmem_limit_bytes=VMEM_LIMIT),
        cost_estimate=pl.CostEstimate(
            flops=flops, transcendentals=0, bytes_accessed=bytes_acc),
    )(cols, w_pad, b_pad)
    return out[:m]


def _mlp_tail_kernel(x_ref, w1_ref, b1_ref, w2_ref, b2_ref, o_ref, *, n_valid):
    """Fused fc1 + ReLU + (dropout=identity) + fc2 + log_softmax."""
    h = jnp.dot(x_ref[...], w1_ref[...], preferred_element_type=jnp.float32)
    h = jnp.maximum(h + b1_ref[...], 0.0)
    # TODO(synk): eval-mode dropout == identity.
    logits = jnp.dot(h.astype(w2_ref.dtype), w2_ref[...],
                     preferred_element_type=jnp.float32) + b2_ref[...]
    # Mask padded class lanes before the softmax reduction.  NOTE: -1e30 is
    # only safe because logits stay f32 (bf16 would overflow this constant).
    lane = jax.lax.broadcasted_iota(jnp.int32, logits.shape, 1)
    logits = jnp.where(lane < n_valid, logits, -1e30)
    m = jnp.max(logits, axis=-1, keepdims=True)
    s = logits - m
    lse = jnp.log(jnp.sum(jnp.exp(s), axis=-1, keepdims=True))
    o_ref[...] = (s - lse).astype(o_ref.dtype)


def mlp_tail(flat, fw1, fb1, fw2, fb2, *, n_classes, target_rows):
    n, k = flat.shape
    tile_m = min(target_rows, _round_up(n, 8))
    m_pad = _round_up(n, tile_m)
    flat_pad = jnp.pad(flat, ((0, m_pad - n), (0, 0))).astype(jnp.bfloat16)
    flops = 2 * m_pad * k * LANE + 2 * m_pad * LANE * LANE
    bytes_acc = (flat_pad.size * 2 + fw1.size * 2 + fw2.size * 2
                 + (fb1.size + fb2.size) * 4 + m_pad * LANE * 4)
    kernel = functools.partial(_mlp_tail_kernel, n_valid=n_classes)
    return pl.pallas_call(
        kernel,
        out_shape=jax.ShapeDtypeStruct((m_pad, LANE), jnp.float32),
        grid=(m_pad // tile_m,),
        in_specs=[
            pl.BlockSpec((tile_m, k), lambda i: (i, 0)),
            pl.BlockSpec((k, LANE), lambda i: (0, 0)),
            pl.BlockSpec((1, LANE), lambda i: (0, 0)),
            pl.BlockSpec((LANE, LANE), lambda i: (0, 0)),
            pl.BlockSpec((1, LANE), lambda i: (0, 0)),
        ],
        out_specs=pl.BlockSpec((tile_m, LANE), lambda i: (i, 0)),
        compiler_params=pltpu.CompilerParams(
            dimension_semantics=("parallel",),
            vmem_limit_bytes=VMEM_LIMIT),
        cost_estimate=pl.CostEstimate(
            flops=flops, transcendentals=m_pad * LANE,
            bytes_accessed=bytes_acc),
    )(flat_pad, fw1, fb1, fw2, fb2)


# ------------------------------- glue (JAX) --------------------------------

def _im2col_pool_order(x_nhwc, k):
    """im2col with rows grouped by 2x2 pool-window position.

    Returns (4, N*(Ho//2)*(Wo//2), C*k*k).  Column order (c, kh, kw) matches
    PyTorch's weight.reshape(Cout, Cin*k*k); the leading size-4 axis indexes
    (pi, pj) within each 2x2 pooling window so the kernel can pool with a
    simple elementwise max over 4 slabs of one tall matmul.
    """
    n, h, w, c = x_nhwc.shape
    ho, wo = h - k + 1, w - k + 1
    pat = jnp.stack(
        [x_nhwc[:, i:i + ho, j:j + wo, :] for i in range(k) for j in range(k)],
        axis=3)                                        # (N, Ho, Wo, k*k, C)
    pat = pat.transpose(0, 1, 2, 4, 3)                 # (N, Ho, Wo, C, k*k)
    pat = pat.reshape(n, ho // 2, 2, wo // 2, 2, c * k * k)
    pat = pat.transpose(2, 4, 0, 1, 3, 5)              # (pi, pj, N, oi, oj, K)
    return pat.reshape(4, n * (ho // 2) * (wo // 2), c * k * k)


def init_params(key):
    ks = jax.random.split(key, 8)
    scale = 0.05
    return {
        "conv1_w": scale * jax.random.normal(ks[0], (10, 1, 5, 5), jnp.float32),
        "conv1_b": scale * jax.random.normal(ks[1], (10,), jnp.float32),
        "conv2_w": scale * jax.random.normal(ks[2], (20, 10, 5, 5), jnp.float32),
        "conv2_b": scale * jax.random.normal(ks[3], (20,), jnp.float32),
        "fc1_w": scale * jax.random.normal(ks[4], (50, 320), jnp.float32),
        "fc1_b": scale * jax.random.normal(ks[5], (50,), jnp.float32),
        "fc2_w": scale * jax.random.normal(ks[6], (10, 50), jnp.float32),
        "fc2_b": scale * jax.random.normal(ks[7], (10,), jnp.float32),
    }


def _pad_lanes(x, lanes=LANE):
    return jnp.pad(x, [(0, 0)] * (x.ndim - 1) + [(0, lanes - x.shape[-1])])


def preprocess_params(params):
    """One-time: transpose to (K, Cout), pad to 128 lanes, scatter fc1, cast."""
    w1 = _pad_lanes(params["conv1_w"].reshape(10, 25).T).astype(jnp.bfloat16)
    b1 = _pad_lanes(params["conv1_b"].reshape(1, 10)).astype(jnp.float32)
    w2 = _pad_lanes(params["conv2_w"].reshape(20, 250).T).astype(jnp.bfloat16)
    b2 = _pad_lanes(params["conv2_b"].reshape(1, 20)).astype(jnp.float32)
    # fc1: original (50, 320) indexed [out, c*16 + hw]  (PyTorch CHW flatten).
    # Scatter into (16*128, 128) indexed [hw*128 + c, out] so the tail can
    # consume p2.reshape(N, 2048) directly (channels in lanes, no transpose).
    fw1 = params["fc1_w"].reshape(50, 20, 16).transpose(2, 1, 0)  # (hw, c, out)
    fw1 = jnp.pad(fw1, ((0, 0), (0, LANE - 20), (0, LANE - 50)))
    fw1 = fw1.reshape(16 * LANE, LANE).astype(jnp.bfloat16)        # (2048, 128)
    fb1 = _pad_lanes(params["fc1_b"].reshape(1, 50)).astype(jnp.float32)
    fw2 = jnp.pad(params["fc2_w"].T,
                  ((0, LANE - 50), (0, LANE - 10))).astype(jnp.bfloat16)
    fb2 = _pad_lanes(params["fc2_b"].reshape(1, 10)).astype(jnp.float32)
    return dict(conv1_w=w1, conv1_b=b1, conv2_w=w2, conv2_b=b2,
                fc1_w=fw1, fc1_b=fb1, fc2_w=fw2, fc2_b=fb2)


def net_forward(x, pp):
    """Forward pass of Net (eval mode). x: (N, 1, 28, 28) NCHW float32."""
    n = x.shape[0]
    xb = x.astype(jnp.bfloat16).transpose(0, 2, 3, 1)            # (N, 28, 28, 1)

    # conv1 (1->10, k=5) + max_pool(2) + ReLU, fused; channels-last output.
    cols1 = _im2col_pool_order(xb, 5)                            # (4, N*144, 25)
    p1 = conv_pool_relu(cols1, pp["conv1_w"], pp["conv1_b"],
                        target_rows=144 * 32)                    # (N*144, 128)

    # conv2 (10->20, k=5) + Dropout2d(identity) + max_pool(2) + ReLU, fused.
    p1_nhwc = p1.reshape(n, 12, 12, LANE)[:, :, :, :10]          # (N, 12, 12, 10)
    cols2 = _im2col_pool_order(p1_nhwc, 5)                       # (4, N*16, 250)
    p2 = conv_pool_relu(cols2, pp["conv2_w"], pp["conv2_b"],
                        target_rows=16 * 128)                    # (N*16, 128)

    # Flatten is a free row-major merge; fc1's weight was pre-scattered to
    # match the (hw*128 + c) lane-dense layout, so no transpose/slice needed.
    flat = p2.reshape(n, 16 * LANE)                              # (N, 2048)

    # fc1 + ReLU + (dropout=identity) + fc2 + log_softmax, fused tail.
    out = mlp_tail(flat, pp["fc1_w"], pp["fc1_b"], pp["fc2_w"], pp["fc2_b"],
                   n_classes=10, target_rows=1024)               # (m_pad, 128)
    return out[:n, :10]


if __name__ == "__main__":
    key = jax.random.PRNGKey(0)
    k_params, k_x = jax.random.split(key)
    params = init_params(k_params)
    pp = preprocess_params(params)

    # Spatial size 28x28 is implied by the 320-dim flatten in the module.
    x = jax.random.normal(k_x, (2, 1, 28, 28), jnp.float32)

    fwd = jax.jit(net_forward)
    out = jax.block_until_ready(fwd(x, pp))

    assert out.shape == (2, 10)
    assert bool(jnp.all(jnp.isfinite(out)))
    # log_softmax sanity: probabilities sum to 1 per row.
    row_sums = jnp.sum(jnp.exp(out), axis=-1)
    assert bool(jnp.all(jnp.abs(row_sums - 1.0) < 1e-3))
    print("KERNEL_OK")
</pallas_src>

<mosaic_0001>
module attributes {stable_mosaic.version = 11 : i64} {
  func.func @_conv_pool_relu_kernel(%arg0: i32, %arg1: memref<4x288x25xbf16, #tpu.memory_space<vmem>>, %arg2: memref<25x128xbf16, #tpu.memory_space<vmem>>, %arg3: memref<1x128xf32, #tpu.memory_space<vmem>>, %arg4: memref<288x128xbf16, #tpu.memory_space<vmem>>) attributes {dimension_semantics = [#tpu.dimension_semantics<parallel>], iteration_bounds = array<i64: 1>, scalar_prefetch = 0 : i64, scratch_operands = 0 : i64, tpu.core_type = #tpu.core_type<tc>, window_params = [{transform_indices = @transform_0, window_bounds = array<i64: 4, 288, 25>}, {pipeline_mode = #tpu.pipeline_mode<synchronous>, transform_indices = @transform_1, window_bounds = array<i64: 25, 128>}, {pipeline_mode = #tpu.pipeline_mode<synchronous>, transform_indices = @transform_2, window_bounds = array<i64: 1, 128>}, {transform_indices = @transform_3, window_bounds = array<i64: 288, 128>}]} {
    %c0 = arith.constant 0 : index
    %c0_0 = arith.constant 0 : index
    %c0_1 = arith.constant 0 : index
    %0 = vector.load %arg1[%c0, %c0_0, %c0_1] : memref<4x288x25xbf16, #tpu.memory_space<vmem>>, vector<4x288x25xbf16>
    %1 = vector.shape_cast %0 : vector<4x288x25xbf16> to vector<1152x25xbf16>
    %c0_2 = arith.constant 0 : index
    %c0_3 = arith.constant 0 : index
    %2 = vector.load %arg2[%c0_2, %c0_3] : memref<25x128xbf16, #tpu.memory_space<vmem>>, vector<25x128xbf16>
    %cst = arith.constant dense<0.000000e+00> : vector<1152x128xf32>
    %3 = tpu.matmul %1, %2, %cst {dimension_numbers = #tpu.dot_dimension_numbers<[1], [0], [0], [1], [0, 0, 1, 1], [], []>} : vector<1152x25xbf16>, vector<25x128xbf16>, vector<1152x128xf32> -> vector<1152x128xf32>
    %4 = vector.shape_cast %3 : vector<1152x128xf32> to vector<4x288x128xf32>
    %cst_4 = arith.constant dense<0xFF800000> : vector<288x128xf32>
    %5 = vector.multi_reduction <maximumf>, %4, %cst_4 [0] : vector<4x288x128xf32> to vector<288x128xf32>
    %c0_5 = arith.constant 0 : index
    %c0_6 = arith.constant 0 : index
    %6 = vector.load %arg3[%c0_5, %c0_6] : memref<1x128xf32, #tpu.memory_space<vmem>>, vector<1x128xf32>
    %7 = vector.broadcast %6 : vector<1x128xf32> to vector<288x128xf32>
    %8 = arith.addf %5, %7 : vector<288x128xf32>
    %cst_7 = arith.constant 0.000000e+00 : f32
    %9 = vector.broadcast %cst_7 : f32 to vector<288x128xf32>
    %10 = arith.maximumf %8, %9 : vector<288x128xf32>
    %11 = arith.truncf %10 : vector<288x128xf32> to vector<288x128xbf16>
    %c0_8 = arith.constant 0 : index
    %c0_9 = arith.constant 0 : index
    %12 = vector.load %arg4[%c0_8, %c0_9] : memref<288x128xbf16, #tpu.memory_space<vmem>>, vector<288x128xbf16>
    tpu.vector_store %arg4[%c0_8, %c0_9], %11 {strides = array<i32>} : memref<288x128xbf16, #tpu.memory_space<vmem>>, vector<288x128xbf16>,
    return
  }
  func.func @transform_0(%arg0: i32) -> (i32, i32, i32) {
    %c0_i32 = arith.constant 0 : i32
    %c0_i32_0 = arith.constant 0 : i32
    %c0_i32_1 = arith.constant 0 : i32
    return %c0_i32, %arg0, %c0_i32_0 : i32, i32, i32
  }
  func.func @transform_1(%arg0: i32) -> (i32, i32) {
    %c0_i32 = arith.constant 0 : i32
    %c0_i32_0 = arith.constant 0 : i32
    %c0_i32_1 = arith.constant 0 : i32
    return %c0_i32, %c0_i32_0 : i32, i32
  }
  func.func @transform_2(%arg0: i32) -> (i32, i32) {
    %c0_i32 = arith.constant 0 : i32
    %c0_i32_0 = arith.constant 0 : i32
    %c0_i32_1 = arith.constant 0 : i32
    return %c0_i32, %c0_i32_0 : i32, i32
  }
  func.func @transform_3(%arg0: i32) -> (i32, i32) {
    %c0_i32 = arith.constant 0 : i32
    %c0_i32_0 = arith.constant 0 : i32
    return %arg0, %c0_i32 : i32, i32
  }
}

module attributes {stable_mosaic.version = 11 : i64} {
  func.func @_conv_pool_relu_kernel(%arg0: i32, %arg1: memref<4x32x250xbf16, #tpu.memory_space<vmem>>, %arg2: memref<250x128xbf16, #tpu.memory_space<vmem>>, %arg3: memref<1x128xf32, #tpu.memory_space<vmem>>, %arg4: memref<32x128xbf16, #tpu.memory_space<vmem>>) attributes {dimension_semantics = [#tpu.dimension_semantics<parallel>], iteration_bounds = array<i64: 1>, scalar_prefetch = 0 : i64, scratch_operands = 0 : i64, tpu.core_type = #tpu.core_type<tc>, window_params = [{transform_indices = @transform_0, window_bounds = array<i64: 4, 32, 250>}, {pipeline_mode = #tpu.pipeline_mode<synchronous>, transform_indices = @transform_1, window_bounds = array<i64: 250, 128>}, {pipeline_mode = #tpu.pipeline_mode<synchronous>, transform_indices = @transform_2, window_bounds = array<i64: 1, 128>}, {transform_indices = @transform_3, window_bounds = array<i64: 32, 128>}]} {
    %c0 = arith.constant 0 : index
    %c0_0 = arith.constant 0 : index
    %c0_1 = arith.constant 0 : index
    %0 = vector.load %arg1[%c0, %c0_0, %c0_1] : memref<4x32x250xbf16, #tpu.memory_space<vmem>>, vector<4x32x250xbf16>
    %1 = vector.shape_cast %0 : vector<4x32x250xbf16> to vector<128x250xbf16>
    %c0_2 = arith.constant 0 : index
    %c0_3 = arith.constant 0 : index
    %2 = vector.load %arg2[%c0_2, %c0_3] : memref<250x128xbf16, #tpu.memory_space<vmem>>, vector<250x128xbf16>
    %cst = arith.constant dense<0.000000e+00> : vector<128x128xf32>
    %3 = tpu.matmul %1, %2, %cst {dimension_numbers = #tpu.dot_dimension_numbers<[1], [0], [0], [1], [0, 0, 1, 1], [], []>} : vector<128x250xbf16>, vector<250x128xbf16>, vector<128x128xf32> -> vector<128x128xf32>
    %4 = vector.shape_cast %3 : vector<128x128xf32> to vector<4x32x128xf32>
    %cst_4 = arith.constant dense<0xFF800000> : vector<32x128xf32>
    %5 = vector.multi_reduction <maximumf>, %4, %cst_4 [0] : vector<4x32x128xf32> to vector<32x128xf32>
    %c0_5 = arith.constant 0 : index
    %c0_6 = arith.constant 0 : index
    %6 = vector.load %arg3[%c0_5, %c0_6] : memref<1x128xf32, #tpu.memory_space<vmem>>, vector<1x128xf32>
    %7 = vector.broadcast %6 : vector<1x128xf32> to vector<32x128xf32>
    %8 = arith.addf %5, %7 : vector<32x128xf32>
    %cst_7 = arith.constant 0.000000e+00 : f32
    %9 = vector.broadcast %cst_7 : f32 to vector<32x128xf32>
    %10 = arith.maximumf %8, %9 : vector<32x128xf32>
    %11 = arith.truncf %10 : vector<32x128xf32> to vector<32x128xbf16>
    %c0_8 = arith.constant 0 : index
    %c0_9 = arith.constant 0 : index
    %12 = vector.load %arg4[%c0_8, %c0_9] : memref<32x128xbf16, #tpu.memory_space<vmem>>, vector<32x128xbf16>
    tpu.vector_store %arg4[%c0_8, %c0_9], %11 {strides = array<i32>} : memref<32x128xbf16, #tpu.memory_space<vmem>>, vector<32x128xbf16>,
    return
  }
  func.func @transform_0(%arg0: i32) -> (i32, i32, i32) {
    %c0_i32 = arith.constant 0 : i32
    %c0_i32_0 = arith.constant 0 : i32
    %c0_i32_1 = arith.constant 0 : i32
    return %c0_i32, %arg0, %c0_i32_0 : i32, i32, i32
  }
  func.func @transform_1(%arg0: i32) -> (i32, i32) {
    %c0_i32 = arith.constant 0 : i32
    %c0_i32_0 = arith.constant 0 : i32
    %c0_i32_1 = arith.constant 0 : i32
    return %c0_i32, %c0_i32_0 : i32, i32
  }
  func.func @transform_2(%arg0: i32) -> (i32, i32) {
    %c0_i32 = arith.constant 0 : i32
    %c0_i32_0 = arith.constant 0 : i32
    %c0_i32_1 = arith.constant 0 : i32
    return %c0_i32, %c0_i32_0 : i32, i32
  }
  func.func @transform_3(%arg0: i32) -> (i32, i32) {
    %c0_i32 = arith.constant 0 : i32
    %c0_i32_0 = arith.constant 0 : i32
    return %arg0, %c0_i32 : i32, i32
  }
}

module attributes {stable_mosaic.version = 11 : i64} {
  func.func @_mlp_tail_kernel(%arg0: i32, %arg1: memref<8x2048xbf16, #tpu.memory_space<vmem>>, %arg2: memref<2048x128xbf16, #tpu.memory_space<vmem>>, %arg3: memref<1x128xf32, #tpu.memory_space<vmem>>, %arg4: memref<128x128xbf16, #tpu.memory_space<vmem>>, %arg5: memref<1x128xf32, #tpu.memory_space<vmem>>, %arg6: memref<8x128xf32, #tpu.memory_space<vmem>>) attributes {dimension_semantics = [#tpu.dimension_semantics<parallel>], iteration_bounds = array<i64: 1>, scalar_prefetch = 0 : i64, scratch_operands = 0 : i64, tpu.core_type = #tpu.core_type<tc>, window_params = [{transform_indices = @transform_0, window_bounds = array<i64: 8, 2048>}, {pipeline_mode = #tpu.pipeline_mode<synchronous>, transform_indices = @transform_1, window_bounds = array<i64: 2048, 128>}, {pipeline_mode = #tpu.pipeline_mode<synchronous>, transform_indices = @transform_2, window_bounds = array<i64: 1, 128>}, {pipeline_mode = #tpu.pipeline_mode<synchronous>, transform_indices = @transform_3, window_bounds = array<i64: 128, 128>}, {pipeline_mode = #tpu.pipeline_mode<synchronous>, transform_indices = @transform_4, window_bounds = array<i64: 1, 128>}, {transform_indices = @transform_5, window_bounds = array<i64: 8, 128>}]} {
    %c0 = arith.constant 0 : index
    %c0_0 = arith.constant 0 : index
    %0 = vector.load %arg1[%c0, %c0_0] : memref<8x2048xbf16, #tpu.memory_space<vmem>>, vector<8x2048xbf16>
    %c0_1 = arith.constant 0 : index
    %c0_2 = arith.constant 0 : index
    %1 = vector.load %arg2[%c0_1, %c0_2] : memref<2048x128xbf16, #tpu.memory_space<vmem>>, vector<2048x128xbf16>
    %cst = arith.constant dense<0.000000e+00> : vector<8x128xf32>
    %2 = tpu.matmul %0, %1, %cst {dimension_numbers = #tpu.dot_dimension_numbers<[1], [0], [0], [1], [0, 0, 1, 1], [], []>} : vector<8x2048xbf16>, vector<2048x128xbf16>, vector<8x128xf32> -> vector<8x128xf32>
    %c0_3 = arith.constant 0 : index
    %c0_4 = arith.constant 0 : index
    %3 = vector.load %arg3[%c0_3, %c0_4] : memref<1x128xf32, #tpu.memory_space<vmem>>, vector<1x128xf32>
    %4 = vector.broadcast %3 : vector<1x128xf32> to vector<8x128xf32>
    %5 = arith.addf %2, %4 : vector<8x128xf32>
    %cst_5 = arith.constant 0.000000e+00 : f32
    %6 = vector.broadcast %cst_5 : f32 to vector<8x128xf32>
    %7 = arith.maximumf %5, %6 : vector<8x128xf32>
    %8 = arith.truncf %7 : vector<8x128xf32> to vector<8x128xbf16>
    %c0_6 = arith.constant 0 : index
    %c0_7 = arith.constant 0 : index
    %9 = vector.load %arg4[%c0_6, %c0_7] : memref<128x128xbf16, #tpu.memory_space<vmem>>, vector<128x128xbf16>
    %cst_8 = arith.constant dense<0.000000e+00> : vector<8x128xf32>
    %10 = tpu.matmul %8, %9, %cst_8 {dimension_numbers = #tpu.dot_dimension_numbers<[1], [0], [0], [1], [0, 0, 1, 1], [], []>} : vector<8x128xbf16>, vector<128x128xbf16>, vector<8x128xf32> -> vector<8x128xf32>
    %c0_9 = arith.constant 0 : index
    %c0_10 = arith.constant 0 : index
    %11 = vector.load %arg5[%c0_9, %c0_10] : memref<1x128xf32, #tpu.memory_space<vmem>>, vector<1x128xf32>
    %12 = vector.broadcast %11 : vector<1x128xf32> to vector<8x128xf32>
    %13 = arith.addf %10, %12 : vector<8x128xf32>
    %14 = tpu.iota {dimensions = array<i32: 1>} : vector<8x128xi32>
    %c10_i32 = arith.constant 10 : i32
    %15 = vector.broadcast %c10_i32 : i32 to vector<8x128xi32>
    %16 = arith.cmpi slt, %14, %15 : vector<8x128xi32>
    %cst_11 = arith.constant -1.000000e+30 : f32
    %17 = vector.broadcast %cst_11 : f32 to vector<8x128xf32>
    %18 = arith.select %16, %13, %17 : vector<8x128xi1>, vector<8x128xf32>
    %cst_12 = arith.constant dense<0xFF800000> : vector<8xf32>
    %19 = vector.multi_reduction <maximumf>, %18, %cst_12 [1] : vector<8x128xf32> to vector<8xf32>
    %20 = vector.shape_cast %19 : vector<8xf32> to vector<8x1xf32>
    %21 = vector.broadcast %20 : vector<8x1xf32> to vector<8x128xf32>
    %22 = arith.subf %18, %21 : vector<8x128xf32>
    %23 = math.exp %22 : vector<8x128xf32>
    %cst_13 = arith.constant dense<0.000000e+00> : vector<8xf32>
    %24 = vector.multi_reduction <add>, %23, %cst_13 [1] : vector<8x128xf32> to vector<8xf32>
    %25 = vector.shape_cast %24 : vector<8xf32> to vector<8x1xf32>
    %26 = math.log %25 : vector<8x1xf32>
    %27 = vector.broadcast %26 : vector<8x1xf32> to vector<8x128xf32>
    %28 = arith.subf %22, %27 : vector<8x128xf32>
    %c0_14 = arith.constant 0 : index
    %c0_15 = arith.constant 0 : index
    %29 = vector.load %arg6[%c0_14, %c0_15] : memref<8x128xf32, #tpu.memory_space<vmem>>, vector<8x128xf32>
    tpu.vector_store %arg6[%c0_14, %c0_15], %28 {strides = array<i32>} : memref<8x128xf32, #tpu.memory_space<vmem>>, vector<8x128xf32>,
    return
  }
  func.func @transform_0(%arg0: i32) -> (i32, i32) {
    %c0_i32 = arith.constant 0 : i32
    %c0_i32_0 = arith.constant 0 : i32
    return %arg0, %c0_i32 : i32, i32
  }
  func.func @transform_1(%arg0: i32) -> (i32, i32) {
    %c0_i32 = arith.constant 0 : i32
    %c0_i32_0 = arith.constant 0 : i32
    %c0_i32_1 = arith.constant 0 : i32
    return %c0_i32, %c0_i32_0 : i32, i32
  }
  func.func @transform_2(%arg0: i32) -> (i32, i32) {
    %c0_i32 = arith.constant 0 : i32
    %c0_i32_0 = arith.constant 0 : i32
    %c0_i32_1 = arith.constant 0 : i32
    return %c0_i32, %c0_i32_0 : i32, i32
  }
  func.func @transform_3(%arg0: i32) -> (i32, i32) {
    %c0_i32 = arith.constant 0 : i32
    %c0_i32_0 = arith.constant 0 : i32
    %c0_i32_1 = arith.constant 0 : i32
    return %c0_i32, %c0_i32_0 : i32, i32
  }
  func.func @transform_4(%arg0: i32) -> (i32, i32) {
    %c0_i32 = arith.constant 0 : i32
    %c0_i32_0 = arith.constant 0 : i32
    %c0_i32_1 = arith.constant 0 : i32
    return %c0_i32, %c0_i32_0 : i32, i32
  }
  func.func @transform_5(%arg0: i32) -> (i32, i32) {
    %c0_i32 = arith.constant 0 : i32
    %c0_i32_0 = arith.constant 0 : i32
    return %arg0, %c0_i32 : i32, i32
  }
}

</mosaic_0001>

<bundles_post_ra>
// kernel: net_forward.3
= control target key start
LH: loop header
LB: loop body
LE: loop exit
PB: predicated region body
PF: predicated region fallthrough
CT: control target
= control target key end

     0   :  { %vm751_vm0 = vcmask 1043456   ;;  %vm752_vm1 = vcmask 1044480   ;;  %vm534_vm2 = vcmask 203776   ;;  %v2365_v1 = vmov 65535   ;;  %s2991_s1 = inlined_call_operand.vmem [shape: bf16[25,128], index: 1, kind: input, shape index: {}]   ;;  %s2992_s0 = inlined_call_operand.vmem [shape: bf16[4,288,25], index: 0, kind: input, shape index: {}]   ;;  %s2993_s2 = inlined_call_operand.vmem [shape: f32[1,128], index: 2, kind: input, shape index: {}]   ;;  %s2994_s3 = inlined_call_operand.vmem [shape: bf16[288,128], index: 3, kind: output, shape index: {}]  }
   0x1   :  { %v2291_v0 = vld [vmem:[%s2991_s1] sm:$0xff]   ;;  %v753_v2 = vsel %vm751_vm0, 4294967295, %v2365_v1  ;;  %v2292_v3 = vld [vmem:[%s2991_s1 + $0x8] sm:$0x1f]   ;;  %v2297_v10 = vld [vmem:[%s2992_s0 + $0x10] sm:$0xff]  }
   0x2   :  { %2138 = vmatprep.subr.bf16.mxu0 %v2291_v0  ;;  %2286 = vmatprep.subr.bf16.mxu1 %v2291_v0  ;;  %v754_v4 = vsel %vm752_vm1, %v753_v2, 0  ;;  %v2293_v5 = vld [vmem:[%s2992_s0] sm:$0xff]   ;;  %v2294_v8 = vld [vmem:[%s2992_s0 + $0x8] sm:$0xff]   ;;  %v2299_v11 = vld [vmem:[%s2992_s0 + $0x130] sm:$0xff]  }
   0x3   :  { %2139 = vmatpush3.bf16.msra.mxu0 %v2291_v0  ;;  %2288 = vmatpush3.bf16.msra.mxu1 %v2291_v0  ;;  %v756_v6 = vand.u32 %v2292_v3, %v754_v4  ;;  %v2295_v7 = vld [vmem:[%s2992_s0 + $0x120] sm:$0xff]   ;;  %v2296_v9 = vld [vmem:[%s2992_s0 + $0x128] sm:$0xff]   ;;  %v2298_v12 = vld [vmem:[%s2992_s0 + $0x18] sm:$0xff]  }
   0x4   :  { %2142 = vmatprep.mubr.msk.bf16.mxu0 %vm534_vm2, %v2293_v5  ;;  %2214 = vmatprep.mubr.msk.bf16.mxu1 %vm534_vm2, %v2295_v7  ;;  %v2300_v13 = vld [vmem:[%s2992_s0 + $0x138] sm:$0xff]   ;;  %v2301_v14 = vld [vmem:[%s2992_s0 + $0x20] sm:$0xff]   ;;  %v2302_v16 = vld [vmem:[%s2992_s0 + $0x28] sm:$0xff]  }
   0x5   :  { %2140 = vmatprep.subr.bf16.mxu0 %v756_v6  ;;  %2287 = vmatprep.subr.bf16.mxu1 %v756_v6  ;;  %v2303_v15 = vld [vmem:[%s2992_s0 + $0x140] sm:$0xff]   ;;  %v2304_v17 = vld [vmem:[%s2992_s0 + $0x148] sm:$0xff]   ;;  %v2305_v18 = vld [vmem:[%s2992_s0 + $0x30] sm:$0xff]  }
   0x6   :  { %v2307_v19 = vld [vmem:[%s2992_s0 + $0x150] sm:$0xff]   ;;  %v2306_v20 = vld [vmem:[%s2992_s0 + $0x38] sm:$0xff]   ;;  %v2309_v22 = vld [vmem:[%s2992_s0 + $0x40] sm:$0xff]  }
   0x7   :  { %2141 = vmatpush3.bf16.msra.mxu0 %v756_v6  ;;  %2289 = vmatpush3.bf16.msra.mxu1 %v756_v6  ;;  %v2308_v21 = vld [vmem:[%s2992_s0 + $0x158] sm:$0xff]   ;;  %v2311_v23 = vld [vmem:[%s2992_s0 + $0x160] sm:$0xff]   ;;  %v2310_v24 = vld [vmem:[%s2992_s0 + $0x48] sm:$0xff]  }
   0x8   :  { %v2312_v25 = vld [vmem:[%s2992_s0 + $0x168] sm:$0xff]   ;;  %v2313_v26 = vld [vmem:[%s2992_s0 + $0x50] sm:$0xff]   ;;  %v2314_v28 = vld [vmem:[%s2992_s0 + $0x58] sm:$0xff]  }
   0x9   :  { %v2315_v27 = vld [vmem:[%s2992_s0 + $0x170] sm:$0xff]   ;;  %v2316_v29 = vld [vmem:[%s2992_s0 + $0x178] sm:$0xff]   ;;  %v2317_v30 = vld [vmem:[%s2992_s0 + $0x60] sm:$0xff]  }
   0xa   :  { %2143 = vmatmul.mubr.msk.bf16.vlgmr.msra.gmra.mrb[0].mxu0 %vm534_vm2, %v2294_v8  ;;  %2215 = vmatmul.mubr.msk.bf16.vlgmr.msra.gmra.mrb[0].mxu1 %vm534_vm2, %v2296_v9  ;;  %v2319_v31 = vld [vmem:[%s2992_s0 + $0x180] sm:$0xff]   ;;  %v2318_v32 = vld [vmem:[%s2992_s0 + $0x68] sm:$0xff]   ;;  %v2321_v34 = vld [vmem:[%s2992_s0 + $0x70] sm:$0xff]  }
   0xb   :  { %2146 = vmatprep.mubr.msk.bf16.mxu0 %vm534_vm2, %v2297_v10  ;;  %2218 = vmatprep.mubr.msk.bf16.mxu1 %vm534_vm2, %v2299_v11  ;;  %v2320_v33 = vld [vmem:[%s2992_s0 + $0x188] sm:$0xff]   ;;  %v2323_v35 = vld [vmem:[%s2992_s0 + $0x190] sm:$0xff]   ;;  %v2322_v36 = vld [vmem:[%s2992_s0 + $0x78] sm:$0xff]  }
   0xc   :  { %v2324_v37 = vld [vmem:[%s2992_s0 + $0x198] sm:$0xff]   ;;  %v2325_v38 = vld [vmem:[%s2992_s0 + $0x80] sm:$0xff]   ;;  %v2326_v40 = vld [vmem:[%s2992_s0 + $0x88] sm:$0xff]  }
   0xd   :  { %v2327_v39 = vld [vmem:[%s2992_s0 + $0x1a0] sm:$0xff]   ;;  %v2328_v41 = vld [vmem:[%s2992_s0 + $0x1a8] sm:$0xff]   ;;  %v2329_v42 = vld [vmem:[%s2992_s0 + $0x90] sm:$0xff]  }
   0xe   :  { %v2331_v43 = vld [vmem:[%s2992_s0 + $0x1b0] sm:$0xff]   ;;  %v2330_v44 = vld [vmem:[%s2992_s0 + $0x98] sm:$0xff]   ;;  %v2333_v46 = vld [vmem:[%s2992_s0 + $0xa0] sm:$0xff]  }
   0xf   :  { %v2332_v45 = vld [vmem:[%s2992_s0 + $0x1b8] sm:$0xff]   ;;  %v2335_v47 = vld [vmem:[%s2992_s0 + $0x1c0] sm:$0xff]   ;;  %v2334_v48 = vld [vmem:[%s2992_s0 + $0xa8] sm:$0xff]  }
  0x10   :  { %v2336_v49 = vld [vmem:[%s2992_s0 + $0x1c8] sm:$0xff]   ;;  %v2337_v50 = vld [vmem:[%s2992_s0 + $0xb0] sm:$0xff]   ;;  %v2338_v52 = vld [vmem:[%s2992_s0 + $0xb8] sm:$0xff]  }
  0x11   :  { %v2339_v51 = vld [vmem:[%s2992_s0 + $0x1d0] sm:$0xff]   ;;  %v2340_v53 = vld [vmem:[%s2992_s0 + $0x1d8] sm:$0xff]   ;;  %v2341_v54 = vld [vmem:[%s2992_s0 + $0xc0] sm:$0xff]  }
  0x12   :  { %2147 = vmatmul.mubr.msk.bf16.gmra.mrb[4].mxu0 %vm534_vm2, %v2298_v12  ;;  %2219 = vmatmul.mubr.msk.bf16.gmra.mrb[4].mxu1 %vm534_vm2, %v2300_v13  ;;  %v2343_v55 = vld [vmem:[%s2992_s0 + $0x1e0] sm:$0xff]   ;;  %v2342_v56 = vld [vmem:[%s2992_s0 + $0xc8] sm:$0xff]   ;;  %v2345_v58 = vld [vmem:[%s2992_s0 + $0xd0] sm:$0xff]  }
  0x13   :  { %2150 = vmatprep.mubr.msk.bf16.mxu0 %vm534_vm2, %v2301_v14  ;;  %2222 = vmatprep.mubr.msk.bf16.mxu1 %vm534_vm2, %v2303_v15  ;;  %v2344_v57 = vld [vmem:[%s2992_s0 + $0x1e8] sm:$0xff]   ;;  %v2347_v59 = vld [vmem:[%s2992_s0 + $0x1f0] sm:$0xff]   ;;  %v2346_v60 = vld [vmem:[%s2992_s0 + $0xd8] sm:$0xff]  }
  0x14   :  { %v2348_v61 = vld [vmem:[%s2992_s0 + $0x1f8] sm:$0xff]   ;;  %v2349_v62 = vld [vmem:[%s2992_s0 + $0xe0] sm:$0xff]   ;;  %v2350_v0 = vld [vmem:[%s2992_s0 + $0xe8] sm:$0xff]  }
  0x15   :  { %v2351_v63 = vld [vmem:[%s2992_s0 + $0x200] sm:$0xff]   ;;  %v2352_v1 = vld [vmem:[%s2992_s0 + $0x208] sm:$0xff]   ;;  %v2353_v2 = vld [vmem:[%s2992_s0 + $0xf0] sm:$0xff]  }
  0x16   :  { %v2355_v3 = vld [vmem:[%s2992_s0 + $0x210] sm:$0xff]   ;;  %v2354_v4 = vld [vmem:[%s2992_s0 + $0xf8] sm:$0xff]   ;;  %v2357_v6 = vld [vmem:[%s2992_s0 + $0x100] sm:$0xff]  }
  0x17   :  { %v2356_v5 = vld [vmem:[%s2992_s0 + $0x218] sm:$0xff]   ;;  %v2359_v7 = vld [vmem:[%s2992_s0 + $0x220] sm:$0xff]   ;;  %v2358_v8 = vld [vmem:[%s2992_s0 + $0x108] sm:$0xff]  }
  0x18   :  { %v2360_v9 = vld [vmem:[%s2992_s0 + $0x228] sm:$0xff]   ;;  %v2361_v10 = vld [vmem:[%s2992_s0 + $0x110] sm:$0xff]   ;;  %v2362_v12 = vld [vmem:[%s2992_s0 + $0x118] sm:$0xff]  }
  0x19   :  { %v2363_v11 = vld [vmem:[%s2992_s0 + $0x230] sm:$0xff]   ;;  %v2364_v13 = vld [vmem:[%s2992_s0 + $0x238] sm:$0xff]  }
  0x1a   :  { %2151 = vmatmul.mubr.msk.bf16.gmra.mrb[8].mxu0 %vm534_vm2, %v2302_v16  ;;  %2223 = vmatmul.mubr.msk.bf16.gmra.mrb[8].mxu1 %vm534_vm2, %v2304_v17 }
  0x1b   :  { %2154 = vmatprep.mubr.msk.bf16.mxu0 %vm534_vm2, %v2305_v18  ;;  %2226 = vmatprep.mubr.msk.bf16.mxu1 %vm534_vm2, %v2307_v19 }
  0x22   :  { %2155 = vmatmul.mubr.msk.bf16.gmra.mrb[12].mxu0 %vm534_vm2, %v2306_v20  ;;  %2227 = vmatmul.mubr.msk.bf16.gmra.mrb[12].mxu1 %vm534_vm2, %v2308_v21 }
  0x23   :  { %2158 = vmatprep.mubr.msk.bf16.mxu0 %vm534_vm2, %v2309_v22  ;;  %2230 = vmatprep.mubr.msk.bf16.mxu1 %vm534_vm2, %v2311_v23 }
  0x2a   :  { %2159 = vmatmul.mubr.msk.bf16.gmra.mrb[16].mxu0 %vm534_vm2, %v2310_v24  ;;  %2231 = vmatmul.mubr.msk.bf16.gmra.mrb[16].mxu1 %vm534_vm2, %v2312_v25 }
  0x2b   :  { %2162 = vmatprep.mubr.msk.bf16.mxu0 %vm534_vm2, %v2313_v26  ;;  %2234 = vmatprep.mubr.msk.bf16.mxu1 %vm534_vm2, %v2315_v27 }
  0x32   :  { %2163 = vmatmul.mubr.msk.bf16.gmra.mrb[20].mxu0 %vm534_vm2, %v2314_v28  ;;  %2235 = vmatmul.mubr.msk.bf16.gmra.mrb[20].mxu1 %vm534_vm2, %v2316_v29 }
  0x33   :  { %2166 = vmatprep.mubr.msk.bf16.mxu0 %vm534_vm2, %v2317_v30  ;;  %2238 = vmatprep.mubr.msk.bf16.mxu1 %vm534_vm2, %v2319_v31 }
  0x3a   :  { %2167 = vmatmul.mubr.msk.bf16.gmra.mrb[24].mxu0 %vm534_vm2, %v2318_v32  ;;  %2239 = vmatmul.mubr.msk.bf16.gmra.mrb[24].mxu1 %vm534_vm2, %v2320_v33 }
  0x3b   :  { %2170 = vmatprep.mubr.msk.bf16.mxu0 %vm534_vm2, %v2321_v34  ;;  %2242 = vmatprep.mubr.msk.bf16.mxu1 %vm534_vm2, %v2323_v35 }
  0x42   :  { %2171 = vmatmul.mubr.msk.bf16.gmra.mrb[28].mxu0 %vm534_vm2, %v2322_v36  ;;  %2243 = vmatmul.mubr.msk.bf16.gmra.mrb[28].mxu1 %vm534_vm2, %v2324_v37 }
  0x43   :  { %2174 = vmatprep.mubr.msk.bf16.mxu0 %vm534_vm2, %v2325_v38  ;;  %2246 = vmatprep.mubr.msk.bf16.mxu1 %vm534_vm2, %v2327_v39 }
  0x4a   :  { %2175 = vmatmul.mubr.msk.bf16.gmra.mrb[32].mxu0 %vm534_vm2, %v2326_v40  ;;  %2247 = vmatmul.mubr.msk.bf16.gmra.mrb[32].mxu1 %vm534_vm2, %v2328_v41 }
  0x4b   :  { %2178 = vmatprep.mubr.msk.bf16.mxu0 %vm534_vm2, %v2329_v42  ;;  %2250 = vmatprep.mubr.msk.bf16.mxu1 %vm534_vm2, %v2331_v43 }
  0x52   :  { %2179 = vmatmul.mubr.msk.bf16.gmra.mrb[36].mxu0 %vm534_vm2, %v2330_v44  ;;  %2251 = vmatmul.mubr.msk.bf16.gmra.mrb[36].mxu1 %vm534_vm2, %v2332_v45 }
  0x53   :  { %2182 = vmatprep.mubr.msk.bf16.mxu0 %vm534_vm2, %v2333_v46  ;;  %2254 = vmatprep.mubr.msk.bf16.mxu1 %vm534_vm2, %v2335_v47 }
  0x5a   :  { %2183 = vmatmul.mubr.msk.bf16.gmra.mrb[40].mxu0 %vm534_vm2, %v2334_v48  ;;  %2255 = vmatmul.mubr.msk.bf16.gmra.mrb[40].mxu1 %vm534_vm2, %v2336_v49 }
  0x5b   :  { %2186 = vmatprep.mubr.msk.bf16.mxu0 %vm534_vm2, %v2337_v50  ;;  %2258 = vmatprep.mubr.msk.bf16.mxu1 %vm534_vm2, %v2339_v51 }
  0x62   :  { %2187 = vmatmul.mubr.msk.bf16.gmra.mrb[44].mxu0 %vm534_vm2, %v2338_v52  ;;  %2259 = vmatmul.mubr.msk.bf16.gmra.mrb[44].mxu1 %vm534_vm2, %v2340_v53 }
  0x63   :  { %2190 = vmatprep.mubr.msk.bf16.mxu0 %vm534_vm2, %v2341_v54  ;;  %2262 = vmatprep.mubr.msk.bf16.mxu1 %vm534_vm2, %v2343_v55 }
  0x6a   :  { %2191 = vmatmul.mubr.msk.bf16.gmra.mrb[48].mxu0 %vm534_vm2, %v2342_v56  ;;  %2263 = vmatmul.mubr.msk.bf16.gmra.mrb[48].mxu1 %vm534_vm2, %v2344_v57 }
  0x6b   :  { %2194 = vmatprep.mubr.msk.bf16.mxu0 %vm534_vm2, %v2345_v58  ;;  %2266 = vmatprep.mubr.msk.bf16.mxu1 %vm534_vm2, %v2347_v59 }
  0x72   :  { %2195 = vmatmul.mubr.msk.bf16.gmra.mrb[52].mxu0 %vm534_vm2, %v2346_v60  ;;  %2267 = vmatmul.mubr.msk.bf16.gmra.mrb[52].mxu1 %vm534_vm2, %v2348_v61 }
  0x73   :  { %2198 = vmatprep.mubr.msk.bf16.mxu0 %vm534_vm2, %v2349_v62  ;;  %2270 = vmatprep.mubr.msk.bf16.mxu1 %vm534_vm2, %v2351_v63 }
  0x7a   :  { %2199 = vmatmul.mubr.msk.bf16.gmra.mrb[56].mxu0 %vm534_vm2, %v2350_v0  ;;  %2271 = vmatmul.mubr.msk.bf16.gmra.mrb[56].mxu1 %vm534_vm2, %v2352_v1 }
  0x7b   :  { %2202 = vmatprep.mubr.msk.bf16.mxu0 %vm534_vm2, %v2353_v2  ;;  %2274 = vmatprep.mubr.msk.bf16.mxu1 %vm534_vm2, %v2355_v3 }
  0x82   :  { %2203 = vmatmul.mubr.msk.bf16.gmra.mrb[60].mxu0 %vm534_vm2, %v2354_v4  ;;  %2275 = vmatmul.mubr.msk.bf16.gmra.mrb[60].mxu1 %vm534_vm2, %v2356_v5 }
  0x83   :  { %2206 = vmatprep.mubr.msk.bf16.mxu0 %vm534_vm2, %v2357_v6  ;;  %2278 = vmatprep.mubr.msk.bf16.mxu1 %vm534_vm2, %v2359_v7 }
  0x8a   :  { %2207 = vmatmul.mubr.msk.bf16.gmra.mrb[64].mxu0 %vm534_vm2, %v2358_v8  ;;  %2279 = vmatmul.mubr.msk.bf16.gmra.mrb[64].mxu1 %vm534_vm2, %v2360_v9 }
  0x8b   :  { %2210 = vmatprep.mubr.msk.bf16.mxu0 %vm534_vm2, %v2361_v10  ;;  %2282 = vmatprep.mubr.msk.bf16.mxu1 %vm534_vm2, %v2363_v11 }
  0x92   :  { %2211 = vmatmul.mubr.msk.bf16.gmra.mrb[68].mxu0 %vm534_vm2, %v2362_v12  ;;  %2283 = vmatmul.mubr.msk.bf16.gmra.mrb[68].mxu1 %vm534_vm2, %v2364_v13 }
  0xdd   :  { %v2680_v14 = vpop.f32.mrb[0].mxu0  ;;  %v2682_v15 = vpop.f32.mrb[0].mxu1 }
  0xde   :  { %v2684_v16 = vpop.f32.mrb[1].mxu0  ;;  %v2686_v17 = vpop.f32.mrb[1].mxu1 }
  0xdf   :  { %v2688_v18 = vpop.f32.mrb[2].mxu0  ;;  %v2690_v19 = vpop.f32.mrb[2].mxu1 }
  0xe0   :  { %v2692_v20 = vpop.f32.mrb[3].mxu0  ;;  %v2694_v21 = vpop.f32.mrb[3].mxu1 }
  0xe5   :  { %v2696_v22 = vpop.f32.mrb[4].mxu0  ;;  %v2698_v23 = vpop.f32.mrb[4].mxu1 }
  0xe6   :  { %v2700_v24 = vpop.f32.mrb[5].mxu0  ;;  %v2702_v25 = vpop.f32.mrb[5].mxu1 }
  0xe7   :  { %v2704_v26 = vpop.f32.mrb[6].mxu0  ;;  %v2706_v27 = vpop.f32.mrb[6].mxu1 }
  0xe8   :  { %v2708_v28 = vpop.f32.mrb[7].mxu0  ;;  %v2710_v29 = vpop.f32.mrb[7].mxu1 }
  0xed   :  { %v2712_v30 = vpop.f32.mrb[8].mxu0  ;;  %v2714_v31 = vpop.f32.mrb[8].mxu1 }
  0xee   :  { %v2716_v32 = vpop.f32.mrb[9].mxu0  ;;  %v2718_v33 = vpop.f32.mrb[9].mxu1 }
  0xef   :  { %v2720_v34 = vpop.f32.mrb[10].mxu0  ;;  %v2722_v35 = vpop.f32.mrb[10].mxu1 }
  0xf0   :  { %v2724_v36 = vpop.f32.mrb[11].mxu0  ;;  %v2726_v37 = vpop.f32.mrb[11].mxu1 }
  0xf5   :  { %v2728_v38 = vpop.f32.mrb[12].mxu0  ;;  %v2730_v39 = vpop.f32.mrb[12].mxu1 }
  0xf6   :  { %v2732_v40 = vpop.f32.mrb[13].mxu0  ;;  %v2734_v41 = vpop.f32.mrb[13].mxu1 }
  0xf7   :  { %v2736_v42 = vpop.f32.mrb[14].mxu0  ;;  %v2738_v43 = vpop.f32.mrb[14].mxu1 }
  0xf8   :  { %v2740_v44 = vpop.f32.mrb[15].mxu0  ;;  %v2742_v45 = vpop.f32.mrb[15].mxu1 }
  0xfd   :  { %v2744_v46 = vpop.f32.mrb[16].mxu0  ;;  %v2746_v47 = vpop.f32.mrb[16].mxu1 }
  0xfe   :  { %v2748_v48 = vpop.f32.mrb[17].mxu0  ;;  %v2750_v49 = vpop.f32.mrb[17].mxu1 }
  0xff   :  { %v2752_v50 = vpop.f32.mrb[18].mxu0  ;;  %v2754_v51 = vpop.f32.mrb[18].mxu1 }
 0x100   :  { %v2756_v52 = vpop.f32.mrb[19].mxu0  ;;  %v2758_v53 = vpop.f32.mrb[19].mxu1 }
 0x105   :  { %v2760_v54 = vpop.f32.mrb[20].mxu0  ;;  %v2762_v55 = vpop.f32.mrb[20].mxu1 }
 0x106   :  { %v2764_v56 = vpop.f32.mrb[21].mxu0  ;;  %v2766_v57 = vpop.f32.mrb[21].mxu1 }
 0x107   :  { %v2768_v58 = vpop.f32.mrb[22].mxu0  ;;  %v2770_v59 = vpop.f32.mrb[22].mxu1 }
 0x108   :  { %2995 = vst [vmem:[#allocation2_spill] sm:$0xff] %v2770_v59  ;;  %v2772_v60 = vpop.f32.mrb[23].mxu0  ;;  %v2774_v61 = vpop.f32.mrb[23].mxu1 }
 0x109   :  { %2996 = vst [vmem:[#allocation3_spill] sm:$0xff] %v2774_v61 }
 0x10d   :  { %v2776_v62 = vpop.f32.mrb[24].mxu0  ;;  %v2778_v63 = vpop.f32.mrb[24].mxu1 }
 0x10e   :  { %2997 = vst [vmem:[#allocation4_spill] sm:$0xff] %v2776_v62  ;;  %2998 = vst [vmem:[#allocation5_spill] sm:$0xff] %v2778_v63  ;;  %v2780_v0 = vpop.f32.mrb[25].mxu0  ;;  %v2782_v1 = vpop.f32.mrb[25].mxu1 }
 0x10f   :  { %2999 = vst [vmem:[#allocation6_spill] sm:$0xff] %v2780_v0  ;;  %3000 = vst [vmem:[#allocation7_spill] sm:$0xff] %v2782_v1  ;;  %v2784_v2 = vpop.f32.mrb[26].mxu0  ;;  %v2786_v3 = vpop.f32.mrb[26].mxu1 }
 0x110   :  { %3001 = vst [vmem:[#allocation8_spill] sm:$0xff] %v2784_v2  ;;  %3002 = vst [vmem:[#allocation9_spill] sm:$0xff] %v2786_v3  ;;  %v2788_v4 = vpop.f32.mrb[27].mxu0  ;;  %v2790_v5 = vpop.f32.mrb[27].mxu1 }
 0x111   :  { %3003 = vst [vmem:[#allocation10_spill] sm:$0xff] %v2788_v4  ;;  %3004 = vst [vmem:[#allocation11_spill] sm:$0xff] %v2790_v5 }
 0x115   :  { %v2792_v6 = vpop.f32.mrb[28].mxu0  ;;  %v2794_v7 = vpop.f32.mrb[28].mxu1 }
 0x116   :  { %3005 = vst [vmem:[#allocation12_spill] sm:$0xff] %v2792_v6  ;;  %3006 = vst [vmem:[#allocation13_spill] sm:$0xff] %v2794_v7  ;;  %v2796_v8 = vpop.f32.mrb[29].mxu0  ;;  %v2798_v9 = vpop.f32.mrb[29].mxu1 }
 0x117   :  { %3007 = vst [vmem:[#allocation14_spill] sm:$0xff] %v2796_v8  ;;  %3008 = vst [vmem:[#allocation15_spill] sm:$0xff] %v2798_v9  ;;  %v2800_v10 = vpop.f32.mrb[30].mxu0  ;;  %v2802_v11 = vpop.f32.mrb[30].mxu1 }
 0x118   :  { %3009 = vst [vmem:[#allocation16_spill] sm:$0xff] %v2800_v10  ;;  %3010 = vst [vmem:[#allocation17_spill] sm:$0xff] %v2802_v11  ;;  %v2804_v12 = vpop.f32.mrb[31].mxu0  ;;  %v2806_v13 = vpop.f32.mrb[31].mxu1 }
 0x119   :  { %3011 = vst [vmem:[#allocation18_spill] sm:$0xff] %v2804_v12  ;;  %3012 = vst [vmem:[#allocation19_spill] sm:$0xff] %v2806_v13 }
 0x11d   :  { %v2808_v3 = vpop.f32.mrb[32].mxu0  ;;  %v2810_v4 = vpop.f32.mrb[32].mxu1 }
 0x11e   :  { %3013 = vst [vmem:[#allocation20_spill] sm:$0xff] %v2808_v3  ;;  %3014 = vst [vmem:[#allocation21_spill] sm:$0xff] %v2810_v4  ;;  %v2812_v5 = vpop.f32.mrb[33].mxu0  ;;  %v2814_v6 = vpop.f32.mrb[33].mxu1 }
 0x11f   :  { %3015 = vst [vmem:[#allocation22_spill] sm:$0xff] %v2812_v5  ;;  %3016 = vst [vmem:[#allocation23_spill] sm:$0xff] %v2814_v6  ;;  %v2816_v7 = vpop.f32.mrb[34].mxu0  ;;  %v2818_v8 = vpop.f32.mrb[34].mxu1 }
 0x120   :  { %3017 = vst [vmem:[#allocation24_spill] sm:$0xff] %v2816_v7  ;;  %3018 = vst [vmem:[#allocation25_spill] sm:$0xff] %v2818_v8  ;;  %v2820_v9 = vpop.f32.mrb[35].mxu0  ;;  %v2822_v10 = vpop.f32.mrb[35].mxu1 }
 0x121   :  { %3019 = vst [vmem:[#allocation26_spill] sm:$0xff] %v2820_v9  ;;  %3020 = vst [vmem:[#allocation27_spill] sm:$0xff] %v2822_v10  ;;  %v2831_v10 = vld [vmem:[%s2993_s2] ss:$0 sm:$0xff] }
 0x125   :  { %v2180_v11 = vpop.f32.mrb[36].mxu0  ;;  %v2252_v12 = vpop.f32.mrb[36].mxu1 }
 0x126   :  { %v1373_v13 = vmax.f32 %v2680_v14, %v2180_v11  ;;  %v936_v1 = vpop.f32.mrb[37].mxu0  ;;  %v1224_v3 = vpop.f32.mrb[37].mxu1 }
 0x127   :  { %v1367_v4 = vmax.f32 %v2684_v16, %v936_v1  ;;  %v2181_v2 = vpop.f32.mrb[38].mxu0  ;;  %v2253_v5 = vpop.f32.mrb[38].mxu1 }
 0x128   :  { %v1374_v6 = vmax.f32 %v1373_v13, %v2682_v15  ;;  %v1376_v7 = vmax.f32 %v2688_v18, %v2181_v2  ;;  %v939_v63 = vpop.f32.mrb[39].mxu0  ;;  %v1227_v8 = vpop.f32.mrb[39].mxu1 }
 0x129   :  { %v1368_v9 = vmax.f32 %v1367_v4, %v2686_v17  ;;  %v1370_v14 = vmax.f32 %v2692_v20, %v939_v63 }
 0x12a   :  { %v1375_v11 = vmax.f32 %v1374_v6, %v2252_v12  ;;  %v1377_v16 = vmax.f32 %v1376_v7, %v2690_v19 }
 0x12b   :  { %v1369_v1 = vmax.f32 %v1368_v9, %v1224_v3  ;;  %v1371_v0 = vmax.f32 %v1370_v14, %v2694_v21 }
 0x12c   :  { %v1484_v15 = vadd.f32 %v2831_v10, %v1375_v11  ;;  %v1378_v18 = vmax.f32 %v1377_v16, %v2253_v5 }
 0x12d   :  { %v1482_v2 = vadd.f32 %v2831_v10, %v1369_v1  ;;  %v1372_v13 = vmax.f32 %v1371_v0, %v1227_v8  ;;  %v2184_v62 = vpop.f32.mrb[40].mxu0  ;;  %v2256_v61 = vpop.f32.mrb[40].mxu1 }
 0x12e   :  { %v1485_v59 = vadd.f32 %v2831_v10, %v1378_v18  ;;  %v1385_v17 = vmax.f32 %v2696_v22, %v2184_v62  ;;  %v952_v4 = vpop.f32.mrb[41].mxu0  ;;  %v1240_v20 = vpop.f32.mrb[41].mxu1  ;;  %v1520_v6 = vmax.f32 %v1484_v15, 0.0 }
 0x12f   :  { %v1483_v63 = vadd.f32 %v2831_v10, %v1372_v13  ;;  %v1379_v19 = vmax.f32 %v2700_v24, %v952_v4  ;;  %v2185_v3 = vpop.f32.mrb[42].mxu0  ;;  %v2257_v21 = vpop.f32.mrb[42].mxu1  ;;  %v1518_v12 = vmax.f32 %v1482_v2, 0.0 }
 0x130   :  { %v1521_v7 = vmax.f32 %v1485_v59, 0.0  ;;  %v1386_v5 = vmax.f32 %v1385_v17, %v2698_v23  ;;  %v1388_v0 = vmax.f32 %v2704_v26, %v2185_v3  ;;  %v955_v8 = vpop.f32.mrb[43].mxu0  ;;  %v1243_v9 = vpop.f32.mrb[43].mxu1 }
 0x131   :  { %v1519_v14 = vmax.f32 %v1483_v63, 0.0  ;;  %v1380_v22 = vmax.f32 %v1379_v19, %v2702_v25  ;;  %v1382_v62 = vmax.f32 %v2708_v28, %v955_v8 }
 0x132   :  { %v1965_v11 = vpack.c.bf16 %v1521_v7, %v1520_v6  ;;  %v1387_v16 = vmax.f32 %v1386_v5, %v2256_v61  ;;  %v1389_v24 = vmax.f32 %v1388_v0, %v2706_v27 }
 0x133   :  { %v1960_v1 = vpack.c.bf16 %v1519_v14, %v1518_v12  ;;  %v1381_v18 = vmax.f32 %v1380_v22, %v1240_v20  ;;  %v1383_v59 = vmax.f32 %v1382_v62, %v2710_v29 }
 0x134   :  { %2047 = vst [vmem:[%s2994_s3 + $0x8] sm:$0xff] %v1965_v11   ;;  %v1488_v23 = vadd.f32 %v2831_v10, %v1387_v16  ;;  %v1390_v26 = vmax.f32 %v1389_v24, %v2257_v21 }
 0x135   :  { %1961 = vst [vmem:[%s2994_s3] sm:$0xff] %v1960_v1   ;;  %v1486_v25 = vadd.f32 %v2831_v10, %v1381_v18  ;;  %v1384_v28 = vmax.f32 %v1383_v59, %v1243_v9  ;;  %v2188_v61 = vpop.f32.mrb[44].mxu0  ;;  %v2260_v27 = vpop.f32.mrb[44].mxu1 }
 0x136   :  { %v1489_v15 = vadd.f32 %v2831_v10, %v1390_v26  ;;  %v1397_v29 = vmax.f32 %v2712_v30, %v2188_v61  ;;  %v968_v2 = vpop.f32.mrb[45].mxu0  ;;  %v1256_v13 = vpop.f32.mrb[45].mxu1  ;;  %v1524_v19 = vmax.f32 %v1488_v23, 0.0 }
 0x137   :  { %v1487_v17 = vadd.f32 %v2831_v10, %v1384_v28  ;;  %v1391_v4 = vmax.f32 %v2716_v32, %v968_v2  ;;  %v2189_v20 = vpop.f32.mrb[46].mxu0  ;;  %v2261_v63 = vpop.f32.mrb[46].mxu1  ;;  %v1522_v0 = vmax.f32 %v1486_v25, 0.0 }
 0x138   :  { %v1525_v3 = vmax.f32 %v1489_v15, 0.0  ;;  %v1398_v21 = vmax.f32 %v1397_v29, %v2714_v31  ;;  %v1400_v6 = vmax.f32 %v2720_v34, %v2189_v20  ;;  %v971_v7 = vpop.f32.mrb[47].mxu0  ;;  %v1259_v5 = vpop.f32.mrb[47].mxu1 }
 0x139   :  { %v1523_v8 = vmax.f32 %v1487_v17, 0.0  ;;  %v1392_v30 = vmax.f32 %v1391_v4, %v2718_v33  ;;  %v1394_v9 = vmax.f32 %v2724_v36, %v971_v7 }
 0x13a   :  { %v1975_v12 = vpack.c.bf16 %v1525_v3, %v1524_v19  ;;  %v1399_v14 = vmax.f32 %v1398_v21, %v2260_v27  ;;  %v1401_v32 = vmax.f32 %v1400_v6, %v2722_v35 }
 0x13b   :  { %v1970_v22 = vpack.c.bf16 %v1523_v8, %v1522_v0  ;;  %v1393_v62 = vmax.f32 %v1392_v30, %v1256_v13  ;;  %v1395_v11 = vmax.f32 %v1394_v9, %v2726_v37 }
 0x13c   :  { %2049 = vst [vmem:[%s2994_s3 + $0x18] sm:$0xff] %v1975_v12   ;;  %v1492_v31 = vadd.f32 %v2831_v10, %v1399_v14  ;;  %v1402_v34 = vmax.f32 %v1401_v32, %v2261_v63 }
 0x13d   :  { %2048 = vst [vmem:[%s2994_s3 + $0x10] sm:$0xff] %v1970_v22   ;;  %v1490_v33 = vadd.f32 %v2831_v10, %v1393_v62  ;;  %v1396_v36 = vmax.f32 %v1395_v11, %v1259_v5  ;;  %v2192_v16 = vpop.f32.mrb[48].mxu0  ;;  %v2264_v35 = vpop.f32.mrb[48].mxu1 }
 0x13e   :  { %v1493_v24 = vadd.f32 %v2831_v10, %v1402_v34  ;;  %v1409_v37 = vmax.f32 %v2728_v38, %v2192_v16  ;;  %v984_v1 = vpop.f32.mrb[49].mxu0  ;;  %v1272_v18 = vpop.f32.mrb[49].mxu1  ;;  %v1528_v28 = vmax.f32 %v1492_v31, 0.0 }
 0x13f   :  { %v1491_v59 = vadd.f32 %v2831_v10, %v1396_v36  ;;  %v1403_v23 = vmax.f32 %v2732_v40, %v984_v1  ;;  %v2193_v26 = vpop.f32.mrb[50].mxu0  ;;  %v2265_v25 = vpop.f32.mrb[50].mxu1  ;;  %v1526_v13 = vmax.f32 %v1490_v33, 0.0 }
 0x140   :  { %v1529_v61 = vmax.f32 %v1493_v24, 0.0  ;;  %v1410_v27 = vmax.f32 %v1409_v37, %v2730_v39  ;;  %v1412_v15 = vmax.f32 %v2736_v42, %v2193_v26  ;;  %v987_v29 = vpop.f32.mrb[51].mxu0  ;;  %v1275_v2 = vpop.f32.mrb[51].mxu1 }
 0x141   :  { %v1527_v17 = vmax.f32 %v1491_v59, 0.0  ;;  %v1404_v38 = vmax.f32 %v1403_v23, %v2734_v41  ;;  %v1406_v4 = vmax.f32 %v2740_v44, %v987_v29 }
 0x142   :  { %v1985_v20 = vpack.c.bf16 %v1529_v61, %v1528_v28  ;;  %v1411_v63 = vmax.f32 %v1410_v27, %v2264_v35  ;;  %v1413_v40 = vmax.f32 %v1412_v15, %v2738_v43 }
 0x143   :  { %v1980_v19 = vpack.c.bf16 %v1527_v17, %v1526_v13  ;;  %v1405_v3 = vmax.f32 %v1404_v38, %v1272_v18  ;;  %v1407_v21 = vmax.f32 %v1406_v4, %v2742_v45 }
 0x144   :  { %2051 = vst [vmem:[%s2994_s3 + $0x28] sm:$0xff] %v1985_v20   ;;  %v1496_v39 = vadd.f32 %v2831_v10, %v1411_v63  ;;  %v1414_v42 = vmax.f32 %v1413_v40, %v2265_v25 }
 0x145   :  { %2050 = vst [vmem:[%s2994_s3 + $0x20] sm:$0xff] %v1980_v19   ;;  %v1494_v41 = vadd.f32 %v2831_v10, %v1405_v3  ;;  %v1408_v44 = vmax.f32 %v1407_v21, %v1275_v2  ;;  %v2196_v6 = vpop.f32.mrb[52].mxu0  ;;  %v2268_v43 = vpop.f32.mrb[52].mxu1  ;;  %v3021_v3 = vld [vmem:[#allocation2_spill] sm:$0xff] }
 0x146   :  { %v1497_v7 = vadd.f32 %v2831_v10, %v1414_v42  ;;  %v1421_v45 = vmax.f32 %v2744_v46, %v2196_v6  ;;  %v1000_v5 = vpop.f32.mrb[53].mxu0  ;;  %v1288_v0 = vpop.f32.mrb[53].mxu1  ;;  %v1532_v14 = vmax.f32 %v1496_v39, 0.0  ;;  %v3022_v42 = vld [vmem:[#allocation3_spill] sm:$0xff] }
 0x147   :  { %v1495_v8 = vadd.f32 %v2831_v10, %v1408_v44  ;;  %v1415_v30 = vmax.f32 %v2748_v48, %v1000_v5  ;;  %v2197_v9 = vpop.f32.mrb[54].mxu0  ;;  %v2269_v12 = vpop.f32.mrb[54].mxu1  ;;  %v1530_v34 = vmax.f32 %v1494_v41, 0.0 }
 0x148   :  { %v1533_v32 = vmax.f32 %v1497_v7, 0.0  ;;  %v1422_v22 = vmax.f32 %v1421_v45, %v2746_v47  ;;  %v1424_v62 = vmax.f32 %v2752_v50, %v2197_v9  ;;  %v1003_v11 = vpop.f32.mrb[55].mxu0  ;;  %v1291_v31 = vpop.f32.mrb[55].mxu1  ;;  %v3023_v7 = vld [vmem:[#allocation4_spill] sm:$0xff] }
 0x149   :  { %v1531_v33 = vmax.f32 %v1495_v8, 0.0  ;;  %v1416_v46 = vmax.f32 %v1415_v30, %v2750_v49  ;;  %v1418_v36 = vmax.f32 %v2756_v52, %v1003_v11  ;;  %v3024_v30 = vld [vmem:[#allocation6_spill] sm:$0xff] }
 0x14a   :  { %v1995_v16 = vpack.c.bf16 %v1533_v32, %v1532_v14  ;;  %v1423_v35 = vmax.f32 %v1422_v22, %v2268_v43  ;;  %v1425_v48 = vmax.f32 %v1424_v62, %v2754_v51  ;;  %v3025_v62 = vld [vmem:[#allocation5_spill] sm:$0xff] }
 0x14b   :  { %v1990_v24 = vpack.c.bf16 %v1531_v33, %v1530_v34  ;;  %v1417_v37 = vmax.f32 %v1416_v46, %v1288_v0  ;;  %v1419_v1 = vmax.f32 %v1418_v36, %v2758_v53 }
 0x14c   :  { %2053 = vst [vmem:[%s2994_s3 + $0x38] sm:$0xff] %v1995_v16   ;;  %v1500_v47 = vadd.f32 %v2831_v10, %v1423_v35  ;;  %v1426_v50 = vmax.f32 %v1425_v48, %v2269_v12  ;;  %v3027_v35 = vld [vmem:[#allocation7_spill] sm:$0xff] }
 0x14d   :  { %2052 = vst [vmem:[%s2994_s3 + $0x30] sm:$0xff] %v1990_v24   ;;  %v1498_v49 = vadd.f32 %v2831_v10, %v1417_v37  ;;  %v1420_v52 = vmax.f32 %v1419_v1, %v1291_v31  ;;  %v2200_v18 = vpop.f32.mrb[56].mxu0  ;;  %v2272_v51 = vpop.f32.mrb[56].mxu1  ;;  %v3026_v31 = vld [vmem:[#allocation8_spill] sm:$0xff]  ;;  %v3028_v24 = vld [vmem:[#allocation10_spill] sm:$0xff] }
 0x14e   :  { %v1501_v59 = vadd.f32 %v2831_v10, %v1426_v50  ;;  %v1433_v53 = vmax.f32 %v2760_v54, %v2200_v18  ;;  %v1016_v23 = vpop.f32.mrb[57].mxu0  ;;  %v1304_v26 = vpop.f32.mrb[57].mxu1  ;;  %v1536_v15 = vmax.f32 %v1500_v47, 0.0  ;;  %v3029_v50 = vld [vmem:[#allocation9_spill] sm:$0xff] }
 0x14f   :  { %v1499_v25 = vadd.f32 %v2831_v10, %v1420_v52  ;;  %v1427_v28 = vmax.f32 %v2764_v56, %v1016_v23  ;;  %v2201_v61 = vpop.f32.mrb[58].mxu0  ;;  %v2273_v27 = vpop.f32.mrb[58].mxu1  ;;  %v1534_v4 = vmax.f32 %v1498_v49, 0.0 }
 0x150   :  { %v1537_v29 = vmax.f32 %v1501_v59, 0.0  ;;  %v1434_v2 = vmax.f32 %v1433_v53, %v2762_v55  ;;  %v1436_v13 = vmax.f32 %v2768_v58, %v2201_v61  ;;  %v1019_v17 = vpop.f32.mrb[59].mxu0  ;;  %v1307_v38 = vpop.f32.mrb[59].mxu1 }
 0x151   :  { %v1535_v20 = vmax.f32 %v1499_v25, 0.0  ;;  %v1428_v54 = vmax.f32 %v1427_v28, %v2766_v57  ;;  %v1430_v63 = vmax.f32 %v2772_v60, %v1019_v17 }
 0x152   :  { %v2005_v40 = vpack.c.bf16 %v1537_v29, %v1536_v15  ;;  %v1435_v19 = vmax.f32 %v1434_v2, %v2272_v51  ;;  %v1437_v56 = vmax.f32 %v1436_v13, %v3021_v3  ;;  %v3030_v51 = vld [vmem:[#allocation11_spill] sm:$0xff]  ;;  %v3031_v15 = vld [vmem:[#allocation12_spill] sm:$0xff] }
 0x153   :  { %v2000_v21 = vpack.c.bf16 %v1535_v20, %v1534_v4  ;;  %v1429_v39 = vmax.f32 %v1428_v54, %v1304_v26  ;;  %v1431_v41 = vmax.f32 %v1430_v63, %v3022_v42 }
 0x154   :  { %2055 = vst [vmem:[%s2994_s3 + $0x48] sm:$0xff] %v2005_v40   ;;  %v1504_v55 = vadd.f32 %v2831_v10, %v1435_v19  ;;  %v1438_v58 = vmax.f32 %v1437_v56, %v2273_v27  ;;  %v3033_v19 = vld [vmem:[#allocation13_spill] sm:$0xff]  ;;  %v3034_v56 = vld [vmem:[#allocation16_spill] sm:$0xff] }
 0x155   :  { %2054 = vst [vmem:[%s2994_s3 + $0x40] sm:$0xff] %v2000_v21   ;;  %v1502_v57 = vadd.f32 %v2831_v10, %v1429_v39  ;;  %v1432_v60 = vmax.f32 %v1431_v41, %v1307_v38  ;;  %v2204_v44 = vpop.f32.mrb[60].mxu0  ;;  %v2276_v6 = vpop.f32.mrb[60].mxu1  ;;  %v3032_v38 = vld [vmem:[#allocation14_spill] sm:$0xff] }
 0x156   :  { %v1505_v43 = vadd.f32 %v2831_v10, %v1438_v58  ;;  %v1445_v45 = vmax.f32 %v3023_v7, %v2204_v44  ;;  %v1032_v5 = vpop.f32.mrb[61].mxu0  ;;  %v1320_v0 = vpop.f32.mrb[61].mxu1  ;;  %v1540_v32 = vmax.f32 %v1504_v55, 0.0  ;;  %v3035_v58 = vld [vmem:[#allocation15_spill] sm:$0xff]  ;;  %v3037_v7 = vld [vmem:[#allocation17_spill] sm:$0xff] }
 0x157   :  { %v1503_v8 = vadd.f32 %v2831_v10, %v1432_v60  ;;  %v1439_v9 = vmax.f32 %v3024_v30, %v1032_v5  ;;  %v2205_v12 = vpop.f32.mrb[62].mxu0  ;;  %v2277_v14 = vpop.f32.mrb[62].mxu1  ;;  %v1538_v36 = vmax.f32 %v1502_v57, 0.0  ;;  %v3036_v60 = vld [vmem:[#allocation18_spill] sm:$0xff] }
 0x158   :  { %v1541_v22 = vmax.f32 %v1505_v43, 0.0  ;;  %v1446_v11 = vmax.f32 %v1445_v45, %v3025_v62  ;;  %v1448_v34 = vmax.f32 %v3026_v31, %v2205_v12  ;;  %v1035_v33 = vpop.f32.mrb[63].mxu0  ;;  %v1323_v46 = vpop.f32.mrb[63].mxu1  ;;  %v3039_v31 = vld [vmem:[#allocation20_spill] sm:$0xff] }
 0x159   :  { %v1539_v16 = vmax.f32 %v1503_v8, 0.0  ;;  %v1440_v48 = vmax.f32 %v1439_v9, %v3027_v35  ;;  %v1442_v37 = vmax.f32 %v3028_v24, %v1035_v33  ;;  %v3038_v8 = vld [vmem:[#allocation19_spill] sm:$0xff] }
 0x15a   :  { %v2015_v1 = vpack.c.bf16 %v1541_v22, %v1540_v32  ;;  %v1447_v47 = vmax.f32 %v1446_v11, %v2276_v6  ;;  %v1449_v49 = vmax.f32 %v1448_v34, %v3029_v50 }
 0x15b   :  { %v2010_v52 = vpack.c.bf16 %v1539_v16, %v1538_v36  ;;  %v1441_v18 = vmax.f32 %v1440_v48, %v1320_v0  ;;  %v1443_v59 = vmax.f32 %v1442_v37, %v3030_v51  ;;  %v3040_v16 = vld [vmem:[#allocation22_spill] sm:$0xff] }
 0x15c   :  { %2057 = vst [vmem:[%s2994_s3 + $0x58] sm:$0xff] %v2015_v1   ;;  %v1508_v53 = vadd.f32 %v2831_v10, %v1447_v47  ;;  %v1450_v23 = vmax.f32 %v1449_v49, %v2277_v14  ;;  %v3041_v47 = vld [vmem:[#allocation21_spill] sm:$0xff]  ;;  %v3042_v49 = vld [vmem:[#allocation24_spill] sm:$0xff] }
 0x15d   :  { %2056 = vst [vmem:[%s2994_s3 + $0x50] sm:$0xff] %v2010_v52   ;;  %v1506_v26 = vadd.f32 %v2831_v10, %v1441_v18  ;;  %v1444_v25 = vmax.f32 %v1443_v59, %v1323_v46  ;;  %v2208_v28 = vpop.f32.mrb[64].mxu0  ;;  %v2280_v61 = vpop.f32.mrb[64].mxu1 }
 0x15e   :  { %v1509_v27 = vadd.f32 %v2831_v10, %v1450_v23  ;;  %v1457_v29 = vmax.f32 %v3031_v15, %v2208_v28  ;;  %v1048_v2 = vpop.f32.mrb[65].mxu0  ;;  %v1336_v13 = vpop.f32.mrb[65].mxu1  ;;  %v1544_v63 = vmax.f32 %v1508_v53, 0.0  ;;  %v3043_v23 = vld [vmem:[#allocation23_spill] sm:$0xff]  ;;  %v3045_v15 = vld [vmem:[#allocation25_spill] sm:$0xff] }
 0x15f   :  { %v1507_v17 = vadd.f32 %v2831_v10, %v1444_v25  ;;  %v1451_v4 = vmax.f32 %v3032_v38, %v1048_v2  ;;  %v2209_v20 = vpop.f32.mrb[66].mxu0  ;;  %v2281_v54 = vpop.f32.mrb[66].mxu1  ;;  %v1542_v41 = vmax.f32 %v1506_v26, 0.0  ;;  %v3044_v25 = vld [vmem:[#allocation26_spill] sm:$0xff] }
 0x160   :  { %v1545_v40 = vmax.f32 %v1509_v27, 0.0  ;;  %v1458_v3 = vmax.f32 %v1457_v29, %v3033_v19  ;;  %v1460_v21 = vmax.f32 %v3034_v56, %v2209_v20  ;;  %v1051_v39 = vpop.f32.mrb[67].mxu0  ;;  %v1339_v42 = vpop.f32.mrb[67].mxu1 }
 0x161   :  { %v1543_v55 = vmax.f32 %v1507_v17, 0.0  ;;  %v1452_v57 = vmax.f32 %v1451_v4, %v3035_v58  ;;  %v1454_v44 = vmax.f32 %v3036_v60, %v1051_v39  ;;  %v3046_v17 = vld [vmem:[#allocation27_spill] sm:$0xff] }
 0x162   :  { %v2025_v6 = vpack.c.bf16 %v1545_v40, %v1544_v63  ;;  %v1459_v43 = vmax.f32 %v1458_v3, %v2280_v61  ;;  %v1461_v45 = vmax.f32 %v1460_v21, %v3037_v7 }
 0x163   :  { %v2020_v5 = vpack.c.bf16 %v1543_v55, %v1542_v41  ;;  %v1453_v0 = vmax.f32 %v1452_v57, %v1336_v13  ;;  %v1455_v30 = vmax.f32 %v1454_v44, %v3038_v8 }
 0x164   :  { %2059 = vst [vmem:[%s2994_s3 + $0x68] sm:$0xff] %v2025_v6   ;;  %v1512_v9 = vadd.f32 %v2831_v10, %v1459_v43  ;;  %v1462_v12 = vmax.f32 %v1461_v45, %v2281_v54 }
 0x165   :  { %2058 = vst [vmem:[%s2994_s3 + $0x60] sm:$0xff] %v2020_v5   ;;  %v1510_v14 = vadd.f32 %v2831_v10, %v1453_v0  ;;  %v1456_v32 = vmax.f32 %v1455_v30, %v1339_v42  ;;  %v2212_v22 = vpop.f32.mrb[68].mxu0  ;;  %v2284_v62 = vpop.f32.mrb[68].mxu1 }
 0x166   :  { %v1513_v11 = vadd.f32 %v2831_v10, %v1462_v12  ;;  %v1469_v34 = vmax.f32 %v3039_v31, %v2212_v22  ;;  %v1064_v33 = vpop.f32.mrb[69].mxu0  ;;  %v1352_v46 = vpop.f32.mrb[69].mxu1  ;;  %v1548_v37 = vmax.f32 %v1512_v9, 0.0 }
 0x167   :  { %v1511_v36 = vadd.f32 %v2831_v10, %v1456_v32  ;;  %v1463_v35 = vmax.f32 %v3040_v16, %v1064_v33  ;;  %v2213_v48 = vpop.f32.mrb[70].mxu0  ;;  %v2285_v24 = vpop.f32.mrb[70].mxu1  ;;  %v1546_v59 = vmax.f32 %v1510_v14, 0.0 }
 0x168   :  { %v1549_v1 = vmax.f32 %v1513_v11, 0.0  ;;  %v1470_v50 = vmax.f32 %v1469_v34, %v3041_v47  ;;  %v1472_v52 = vmax.f32 %v3042_v49, %v2213_v48  ;;  %v1067_v18 = vpop.f32.mrb[71].mxu0  ;;  %v1355_v51 = vpop.f32.mrb[71].mxu1 }
 0x169   :  { %v1547_v53 = vmax.f32 %v1511_v36, 0.0  ;;  %v1464_v26 = vmax.f32 %v1463_v35, %v3043_v23  ;;  %v1466_v28 = vmax.f32 %v3044_v25, %v1067_v18 }
 0x16a   :  { %v2035_v61 = vpack.c.bf16 %v1549_v1, %v1548_v37  ;;  %v1471_v27 = vmax.f32 %v1470_v50, %v2284_v62  ;;  %v1473_v29 = vmax.f32 %v1472_v52, %v3045_v15 }
 0x16b   :  { %v2030_v2 = vpack.c.bf16 %v1547_v53, %v1546_v59  ;;  %v1465_v13 = vmax.f32 %v1464_v26, %v1352_v46  ;;  %v1467_v38 = vmax.f32 %v1466_v28, %v3046_v17 }
 0x16c   :  { %2061 = vst [vmem:[%s2994_s3 + $0x78] sm:$0xff] %v2035_v61   ;;  %v1516_v4 = vadd.f32 %v2831_v10, %v1471_v27  ;;  %v1474_v20 = vmax.f32 %v1473_v29, %v2285_v24 }
 0x16d   :  { %2060 = vst [vmem:[%s2994_s3 + $0x70] sm:$0xff] %v2030_v2   ;;  %v1514_v54 = vadd.f32 %v2831_v10, %v1465_v13  ;;  %v1468_v63 = vmax.f32 %v1467_v38, %v1355_v51 }
 0x16e   :  { %v1517_v40 = vadd.f32 %v2831_v10, %v1474_v20  ;;  %v1552_v3 = vmax.f32 %v1516_v4, 0.0 }
 0x16f   :  { %v1515_v19 = vadd.f32 %v2831_v10, %v1468_v63  ;;  %v1550_v21 = vmax.f32 %v1514_v54, 0.0 }
 0x170   :  { %v1553_v56 = vmax.f32 %v1517_v40, 0.0 }
 0x171   :  { %v1551_v39 = vmax.f32 %v1515_v19, 0.0 }
 0x172   :  { %v2045_v42 = vpack.c.bf16 %v1553_v56, %v1552_v3 }
 0x173   :  { %v2040_v41 = vpack.c.bf16 %v1551_v39, %v1550_v21 }
 0x174   :  { %2063 = vst [vmem:[%s2994_s3 + $0x88] sm:$0xff] %v2045_v42  }
 0x175   :  { %2062 = vst [vmem:[%s2994_s3 + $0x80] sm:$0xff] %v2040_v41  }

// kernel: net_forward.4
= control target key start
LH: loop header
LB: loop body
LE: loop exit
PB: predicated region body
PF: predicated region fallthrough
CT: control target
= control target key end

     0   :  { %vm230_vm0 = vcmask 998400   ;;  %vm255_vm1 = vcmask 1044480   ;;  %s722_s1 = inlined_call_operand.vmem [shape: bf16[250,128], index: 1, kind: input, shape index: {}]   ;;  %s723_s0 = inlined_call_operand.vmem [shape: bf16[4,32,250], index: 0, kind: input, shape index: {}]   ;;  %s724_s2 = inlined_call_operand.vmem [shape: f32[1,128], index: 2, kind: input, shape index: {}]   ;;  %s725_s3 = inlined_call_operand.vmem [shape: bf16[32,128], index: 3, kind: output, shape index: {}]  }
   0x1   :  { %v549_v0 = vld [vmem:[%s722_s1 + $0x40] sm:$0xff]   ;;  %v551_v2 = vld [vmem:[%s722_s1 + $0x48] sm:$0xff]   ;;  %v553_v4 = vld [vmem:[%s722_s1 + $0x50] sm:$0xff]  }
   0x2   :  { %v550_v1 = vld [vmem:[%s722_s1] sm:$0xff]   ;;  %467 = vmatprep.subr.bf16.mxu0 %v549_v0  ;;  %531 = vmatprep.subr.bf16.mxu1 %v549_v0  ;;  %v552_v3 = vld [vmem:[%s722_s1 + $0x8] sm:$0xff]   ;;  %v554_v5 = vld [vmem:[%s722_s1 + $0x10] sm:$0xff]  }
   0x3   :  { %468 = vmatpush3.bf16.msra.mxu0 %v550_v1  ;;  %539 = vmatpush3.bf16.msra.mxu1 %v550_v1  ;;  %v555_v6 = vld [vmem:[%s722_s1 + $0x58] sm:$0xff]   ;;  %v557_v8 = vld [vmem:[%s722_s1 + $0x60] sm:$0xff]   ;;  %v559_v10 = vld [vmem:[%s722_s1 + $0x68] sm:$0xff]  }
   0x4   :  { %469 = vmatprep.subr.bf16.mxu0 %v551_v2  ;;  %532 = vmatprep.subr.bf16.mxu1 %v551_v2  ;;  %v556_v7 = vld [vmem:[%s722_s1 + $0x18] sm:$0xff]   ;;  %v558_v9 = vld [vmem:[%s722_s1 + $0x20] sm:$0xff]   ;;  %v560_v13 = vld [vmem:[%s722_s1 + $0x28] sm:$0xff]  }
   0x5   :  { %v567_v11 = vld [vmem:[%s723_s0 + $0x4] ss:$8 sps:$4 sm:$0xff]   ;;  %v561_v14 = vld [vmem:[%s722_s1 + $0x70] sm:$0xff]   ;;  %v563_v16 = vld [vmem:[%s722_s1 + $0x78] sm:$0x1f]  }
   0x6   :  { %v570_v12 = vld [vmem:[%s723_s0 + $0x44] ss:$8 sps:$4 sm:$0xff]   ;;  %439 = vmatprep.mubr.msk.bf16.mxu0 %vm230_vm0, %v567_v11  ;;  %v562_v15 = vld [vmem:[%s722_s1 + $0x30] sm:$0xff]   ;;  %v564_v17 = vld [vmem:[%s722_s1 + $0x38] sm:$0xff]  }
   0x7   :  { %470 = vmatpush3.bf16.msra.mxu0 %v552_v3  ;;  %540 = vmatpush3.bf16.msra.mxu1 %v552_v3  ;;  %v565_v18 = vld [vmem:[%s723_s0] ss:$8 sps:$4 sm:$0xff]   ;;  %v571_v20 = vld [vmem:[%s723_s0 + $0x14] ss:$8 sps:$4 sm:$0xff]   ;;  %v573_v22 = vld [vmem:[%s723_s0 + $0x10] ss:$8 sps:$4 sm:$0xff]  }
   0x8   :  { %471 = vmatprep.subr.bf16.mxu0 %v553_v4  ;;  %533 = vmatprep.subr.bf16.mxu1 %v553_v4  ;;  %v568_v19 = vld [vmem:[%s723_s0 + $0x40] ss:$8 sps:$4 sm:$0xff]   ;;  %v574_v21 = vld [vmem:[%s723_s0 + $0x54] ss:$8 sps:$4 sm:$0xff]   ;;  %v576_v23 = vld [vmem:[%s723_s0 + $0x50] ss:$8 sps:$4 sm:$0xff]  }
   0x9   :  { %443 = vmatprep.mubr.msk.bf16.mxu1 %vm230_vm0, %v570_v12  ;;  %v577_v24 = vld [vmem:[%s723_s0 + $0x24] ss:$8 sps:$4 sm:$0xff]   ;;  %v579_v26 = vld [vmem:[%s723_s0 + $0x20] ss:$8 sps:$4 sm:$0xff]   ;;  %v583_v28 = vld [vmem:[%s723_s0 + $0x34] ss:$8 sps:$4 sm:$0xff]  }
   0xa   :  { %v580_v25 = vld [vmem:[%s723_s0 + $0x64] ss:$8 sps:$4 sm:$0xff]   ;;  %v582_v27 = vld [vmem:[%s723_s0 + $0x60] ss:$8 sps:$4 sm:$0xff]   ;;  %v586_v29 = vld [vmem:[%s723_s0 + $0x74] ss:$8 sps:$4 sm:$0xff]  }
   0xb   :  { %472 = vmatpush3.bf16.msra.mxu0 %v554_v5  ;;  %541 = vmatpush3.bf16.msra.mxu1 %v554_v5  ;;  %v585_v30 = vld [vmem:[%s723_s0 + $0x30] ss:$8 sps:$4 sm:$0xff]  }
   0xc   :  { %473 = vmatprep.subr.bf16.mxu0 %v555_v6  ;;  %534 = vmatprep.subr.bf16.mxu1 %v555_v6  ;;  %v588_v31 = vld [vmem:[%s723_s0 + $0x70] ss:$8 sps:$4 sm:$0xff]  }
   0xf   :  { %474 = vmatpush3.bf16.msra.mxu0 %v556_v7  ;;  %542 = vmatpush3.bf16.msra.mxu1 %v556_v7  ;;  %v447_v7 = vld [vmem:[%s724_s2] ss:$0 sm:$0xff] }
  0x10   :  { %475 = vmatprep.subr.bf16.mxu0 %v557_v8  ;;  %535 = vmatprep.subr.bf16.mxu1 %v557_v8 }
  0x13   :  { %476 = vmatpush3.bf16.msra.mxu0 %v558_v9  ;;  %543 = vmatpush3.bf16.msra.mxu1 %v558_v9 }
  0x14   :  { %477 = vmatprep.subr.bf16.mxu0 %v559_v10  ;;  %536 = vmatprep.subr.bf16.mxu1 %v559_v10 }
  0x17   :  { %478 = vmatpush3.bf16.msra.mxu0 %v560_v13  ;;  %544 = vmatpush3.bf16.msra.mxu1 %v560_v13 }
  0x18   :  { %479 = vmatprep.subr.bf16.mxu0 %v561_v14  ;;  %537 = vmatprep.subr.bf16.mxu1 %v561_v14 }
  0x1b   :  { %480 = vmatpush3.bf16.msra.mxu0 %v562_v15  ;;  %545 = vmatpush3.bf16.msra.mxu1 %v562_v15 }
  0x1c   :  { %547 = vmatprep.subr.msk.bf16.mxu0 %vm255_vm1, %v563_v16  ;;  %548 = vmatprep.subr.msk.bf16.mxu1 %vm255_vm1, %v563_v16 }
  0x1f   :  { %482 = vmatpush3.bf16.msra.mxu0 %v564_v17  ;;  %546 = vmatpush3.bf16.msra.mxu1 %v564_v17 }
  0x22   :  { %292 = vmatmul.mubr.bf16.vlgmr.msra.gmra.mrb[0].mxu0 %v565_v18  ;;  %324 = vmatmul.mubr.bf16.vlgmr.msra.gmra.mrb[0].mxu1 %v568_v19 }
  0x23   :  { %440 = vmatprep.mubr.msk.bf16.mxu0 %vm230_vm0, %v571_v20  ;;  %444 = vmatprep.mubr.msk.bf16.mxu1 %vm230_vm0, %v574_v21 }
  0x2a   :  { %300 = vmatmul.mubr.bf16.gmra.mrb[4].mxu0 %v573_v22  ;;  %332 = vmatmul.mubr.bf16.gmra.mrb[4].mxu1 %v576_v23 }
  0x2b   :  { %441 = vmatprep.mubr.msk.bf16.mxu0 %vm230_vm0, %v577_v24  ;;  %445 = vmatprep.mubr.msk.bf16.mxu1 %vm230_vm0, %v580_v25 }
  0x32   :  { %308 = vmatmul.mubr.bf16.gmra.mrb[8].mxu0 %v579_v26  ;;  %340 = vmatmul.mubr.bf16.gmra.mrb[8].mxu1 %v582_v27 }
  0x33   :  { %442 = vmatprep.mubr.msk.bf16.mxu0 %vm230_vm0, %v583_v28  ;;  %446 = vmatprep.mubr.msk.bf16.mxu1 %vm230_vm0, %v586_v29 }
  0x3a   :  { %316 = vmatmul.mubr.bf16.gmra.mrb[12].mxu0 %v585_v30  ;;  %348 = vmatmul.mubr.bf16.gmra.mrb[12].mxu1 %v588_v31 }
  0xf5   :  { %v483_v32 = vpop.f32.mrb[0].mxu0  ;;  %v507_v33 = vpop.f32.mrb[0].mxu1 }
  0xf6   :  { %v484_v34 = vpop.f32.mrb[1].mxu0  ;;  %v508_v35 = vpop.f32.mrb[1].mxu1 }
  0xf7   :  { %v485_v36 = vadd.f32 %v484_v34, %v483_v32  ;;  %v486_v37 = vpop.f32.mrb[2].mxu0  ;;  %v509_v38 = vadd.f32 %v508_v35, %v507_v33  ;;  %v510_v39 = vpop.f32.mrb[2].mxu1 }
  0xf8   :  { %v487_v40 = vpop.f32.mrb[3].mxu0  ;;  %v511_v41 = vpop.f32.mrb[3].mxu1 }
  0xf9   :  { %v488_v42 = vadd.f32 %v487_v40, %v486_v37  ;;  %v512_v43 = vadd.f32 %v511_v41, %v510_v39 }
  0xfd   :  { %v489_v44 = vpop.f32.mrb[4].mxu0  ;;  %v513_v45 = vpop.f32.mrb[4].mxu1 }
  0xfe   :  { %v490_v46 = vpop.f32.mrb[5].mxu0  ;;  %v514_v47 = vpop.f32.mrb[5].mxu1 }
  0xff   :  { %v491_v48 = vadd.f32 %v490_v46, %v489_v44  ;;  %v492_v49 = vpop.f32.mrb[6].mxu0  ;;  %v515_v50 = vadd.f32 %v514_v47, %v513_v45  ;;  %v516_v51 = vpop.f32.mrb[6].mxu1 }
 0x100   :  { %v493_v52 = vpop.f32.mrb[7].mxu0  ;;  %v517_v53 = vpop.f32.mrb[7].mxu1 }
 0x101   :  { %v494_v54 = vadd.f32 %v493_v52, %v492_v49  ;;  %v518_v55 = vadd.f32 %v517_v53, %v516_v51 }
 0x105   :  { %v495_v56 = vpop.f32.mrb[8].mxu0  ;;  %v519_v57 = vpop.f32.mrb[8].mxu1 }
 0x106   :  { %v496_v58 = vpop.f32.mrb[9].mxu0  ;;  %v520_v59 = vpop.f32.mrb[9].mxu1 }
 0x107   :  { %v497_v60 = vadd.f32 %v496_v58, %v495_v56  ;;  %v498_v61 = vpop.f32.mrb[10].mxu0  ;;  %v521_v62 = vadd.f32 %v520_v59, %v519_v57  ;;  %v522_v63 = vpop.f32.mrb[10].mxu1 }
 0x108   :  { %v499_v0 = vpop.f32.mrb[11].mxu0  ;;  %v523_v1 = vpop.f32.mrb[11].mxu1 }
 0x109   :  { %v356_v2 = vmax.f32 %v485_v36, %v497_v60  ;;  %v500_v3 = vadd.f32 %v499_v0, %v498_v61  ;;  %v524_v4 = vadd.f32 %v523_v1, %v522_v63 }
 0x10b   :  { %v357_v5 = vmax.f32 %v356_v2, %v509_v38  ;;  %v359_v6 = vmax.f32 %v488_v42, %v500_v3 }
 0x10d   :  { %v358_v8 = vmax.f32 %v357_v5, %v521_v62  ;;  %v360_v9 = vmax.f32 %v359_v6, %v512_v43  ;;  %v501_v10 = vpop.f32.mrb[12].mxu0  ;;  %v525_v11 = vpop.f32.mrb[12].mxu1 }
 0x10e   :  { %v502_v12 = vpop.f32.mrb[13].mxu0  ;;  %v526_v13 = vpop.f32.mrb[13].mxu1 }
 0x10f   :  { %v375_v14 = vadd.f32 %v447_v7, %v358_v8  ;;  %v361_v15 = vmax.f32 %v360_v9, %v524_v4  ;;  %v503_v16 = vadd.f32 %v502_v12, %v501_v10  ;;  %v504_v17 = vpop.f32.mrb[14].mxu0  ;;  %v527_v18 = vadd.f32 %v526_v13, %v525_v11  ;;  %v528_v19 = vpop.f32.mrb[14].mxu1 }
 0x110   :  { %v505_v20 = vpop.f32.mrb[15].mxu0  ;;  %v529_v21 = vpop.f32.mrb[15].mxu1 }
 0x111   :  { %v376_v22 = vadd.f32 %v447_v7, %v361_v15  ;;  %v362_v23 = vmax.f32 %v491_v48, %v503_v16  ;;  %v506_v24 = vadd.f32 %v505_v20, %v504_v17  ;;  %v530_v25 = vadd.f32 %v529_v21, %v528_v19 }
 0x112   :  { %v379_v26 = vmax.f32 %v375_v14, 0.0 }
 0x113   :  { %v380_v27 = vmax.f32 %v376_v22, 0.0  ;;  %v363_v28 = vmax.f32 %v362_v23, %v515_v50  ;;  %v365_v29 = vmax.f32 %v494_v54, %v506_v24 }
 0x115   :  { %v459_v30 = vpack.c.bf16 %v380_v27, %v379_v26  ;;  %v364_v31 = vmax.f32 %v363_v28, %v527_v18  ;;  %v366_v32 = vmax.f32 %v365_v29, %v518_v55 }
 0x117   :  { %460 = vst [vmem:[%s725_s3] sm:$0xff] %v459_v30   ;;  %v377_v33 = vadd.f32 %v447_v7, %v364_v31  ;;  %v367_v34 = vmax.f32 %v366_v32, %v530_v25 }
 0x119   :  { %v378_v35 = vadd.f32 %v447_v7, %v367_v34  ;;  %v381_v36 = vmax.f32 %v377_v33, 0.0 }
 0x11b   :  { %v382_v37 = vmax.f32 %v378_v35, 0.0 }
 0x11d   :  { %v464_v38 = vpack.c.bf16 %v382_v37, %v381_v36 }
 0x11f   :  { %466 = vst [vmem:[%s725_s3 + $0x8] sm:$0xff] %v464_v38  }

// kernel: net_forward.5
= control target key start
LH: loop header
LB: loop body
LE: loop exit
PB: predicated region body
PF: predicated region fallthrough
CT: control target
= control target key end

     0   :  { %vm2086_vm0 = vmmov 0   ;;  %s2558_s1 = inlined_call_operand.vmem [shape: bf16[2048,128], index: 1, kind: input, shape index: {}]   ;;  %s2559_s0 = inlined_call_operand.vmem [shape: bf16[8,2048], index: 0, kind: input, shape index: {}]   ;;  %s2560_s3 = inlined_call_operand.vmem [shape: bf16[128,128], index: 3, kind: input, shape index: {}]   ;;  %s2561_s2 = inlined_call_operand.vmem [shape: f32[1,128], index: 2, kind: input, shape index: {}]   ;;  %s2562_s4 = inlined_call_operand.vmem [shape: f32[1,128], index: 4, kind: input, shape index: {}]   ;;  %s2563_s5 = inlined_call_operand.vmem [shape: f32[8,128], index: 5, kind: output, shape index: {}]  }
   0x1   :  { %v1929_v0 = vld [vmem:[%s2558_s1 + $0x40] sm:$0xff]   ;;  %v1933_v4 = vld [vmem:[%s2558_s1 + $0x48] sm:$0xff]   ;;  %v1937_v8 = vld [vmem:[%s2558_s1 + $0x50] sm:$0xff]  }
   0x2   :  { %v1930_v1 = vld [vmem:[%s2558_s1 + $0xc0] sm:$0xff]   ;;  %1722 = vmatprep.subr.bf16.mxu0 %v1929_v0  ;;  %v1934_v5 = vld [vmem:[%s2558_s1 + $0xc8] sm:$0xff]   ;;  %v1938_v9 = vld [vmem:[%s2558_s1 + $0xd0] sm:$0xff]  }
   0x3   :  { %v1931_v2 = vld [vmem:[%s2558_s1] sm:$0xff]   ;;  %1744 = vmatprep.subr.bf16.mxu1 %v1930_v1  ;;  %v1935_v6 = vld [vmem:[%s2558_s1 + $0x8] sm:$0xff]   ;;  %v1939_v10 = vld [vmem:[%s2558_s1 + $0x10] sm:$0xff]  }
   0x4   :  { %v1932_v3 = vld [vmem:[%s2558_s1 + $0x80] sm:$0xff]   ;;  %1723 = vmatpush3.bf16.msra.mxu0 %v1931_v2  ;;  %v1936_v7 = vld [vmem:[%s2558_s1 + $0x88] sm:$0xff]   ;;  %v1940_v11 = vld [vmem:[%s2558_s1 + $0x90] sm:$0xff]  }
   0x5   :  { %1745 = vmatpush3.bf16.msra.mxu1 %v1932_v3  ;;  %1724 = vmatprep.subr.bf16.mxu0 %v1933_v4  ;;  %v1941_v12 = vld [vmem:[%s2558_s1 + $0x58] sm:$0xff]   ;;  %v1945_v16 = vld [vmem:[%s2558_s1 + $0x60] sm:$0xff]   ;;  %v1949_v20 = vld [vmem:[%s2558_s1 + $0x68] sm:$0xff]  }
   0x6   :  { %1746 = vmatprep.subr.bf16.mxu1 %v1934_v5  ;;  %v1942_v13 = vld [vmem:[%s2558_s1 + $0xd8] sm:$0xff]   ;;  %v1946_v17 = vld [vmem:[%s2558_s1 + $0xe0] sm:$0xff]   ;;  %v1950_v21 = vld [vmem:[%s2558_s1 + $0xe8] sm:$0xff]  }
   0x7   :  { %v1943_v14 = vld [vmem:[%s2558_s1 + $0x18] sm:$0xff]   ;;  %v1947_v18 = vld [vmem:[%s2558_s1 + $0x20] sm:$0xff]   ;;  %v1951_v22 = vld [vmem:[%s2558_s1 + $0x28] sm:$0xff]  }
   0x8   :  { %1725 = vmatpush3.bf16.msra.mxu0 %v1935_v6  ;;  %v1944_v15 = vld [vmem:[%s2558_s1 + $0x98] sm:$0xff]   ;;  %v1948_v19 = vld [vmem:[%s2558_s1 + $0xa0] sm:$0xff]   ;;  %v1952_v23 = vld [vmem:[%s2558_s1 + $0xa8] sm:$0xff]  }
   0x9   :  { %1747 = vmatpush3.bf16.msra.mxu1 %v1936_v7  ;;  %1726 = vmatprep.subr.bf16.mxu0 %v1937_v8  ;;  %v1953_v24 = vld [vmem:[%s2558_s1 + $0x70] sm:$0xff]   ;;  %v1957_v28 = vld [vmem:[%s2558_s1 + $0x78] sm:$0xff]   ;;  %v21_v32 = vld [vmem:[%s2559_s0] sm:$0xff] }
   0xa   :  { %1748 = vmatprep.subr.bf16.mxu1 %v1938_v9  ;;  %v1954_v25 = vld [vmem:[%s2558_s1 + $0xf0] sm:$0xff]   ;;  %v1958_v29 = vld [vmem:[%s2558_s1 + $0xf8] sm:$0xff]   ;;  %v22_v33 = vld [vmem:[%s2559_s0 + $0x8] sm:$0xff]  ;;  %v1569_v34 = vcombine.low %v21_v32, %v21_v32  ;;  %v1570_v35 = vcombine.high %v21_v32, %v21_v32 }
   0xb   :  { %v1955_v26 = vld [vmem:[%s2558_s1 + $0x30] sm:$0xff]   ;;  %v1959_v30 = vld [vmem:[%s2558_s1 + $0x38] sm:$0xff]   ;;  %v1571_v36 = vcombine.low %v22_v33, %v22_v33  ;;  %v1572_v37 = vcombine.high %v22_v33, %v22_v33  ;;  %v1965_v38 = vld [vmem:[%s2558_s1 + $0x140] sm:$0xff]  }
   0xc   :  { %1727 = vmatpush3.bf16.msra.mxu0 %v1939_v10  ;;  %v1956_v27 = vld [vmem:[%s2558_s1 + $0xb0] sm:$0xff]   ;;  %v1960_v31 = vld [vmem:[%s2558_s1 + $0xb8] sm:$0xff]   ;;  %v1966_v39 = vld [vmem:[%s2558_s1 + $0x1c0] sm:$0xff]   ;;  %1148 = vmatprep.mubr.bf16.mxu0 %v1570_v35 }
   0xd   :  { %1749 = vmatpush3.bf16.msra.mxu1 %v1940_v11  ;;  %1728 = vmatprep.subr.bf16.mxu0 %v1941_v12  ;;  %v1967_v40 = vld [vmem:[%s2558_s1 + $0x100] sm:$0xff]   ;;  %v1969_v42 = vld [vmem:[%s2558_s1 + $0x148] sm:$0xff]   ;;  %v1973_v46 = vld [vmem:[%s2558_s1 + $0x150] sm:$0xff]  }
   0xe   :  { %1750 = vmatprep.subr.bf16.mxu1 %v1942_v13  ;;  %1188 = vmatprep.mubr.bf16.mxu1 %v1572_v37  ;;  %v1968_v41 = vld [vmem:[%s2558_s1 + $0x180] sm:$0xff]   ;;  %v1970_v43 = vld [vmem:[%s2558_s1 + $0x1c8] sm:$0xff]   ;;  %v1974_v47 = vld [vmem:[%s2558_s1 + $0x1d0] sm:$0xff]  }
   0xf   :  { %v1971_v44 = vld [vmem:[%s2558_s1 + $0x108] sm:$0xff]   ;;  %v1975_v48 = vld [vmem:[%s2558_s1 + $0x110] sm:$0xff]   ;;  %v1977_v50 = vld [vmem:[%s2558_s1 + $0x158] sm:$0xff]  }
  0x10   :  { %1729 = vmatpush3.bf16.msra.mxu0 %v1943_v14  ;;  %v1972_v45 = vld [vmem:[%s2558_s1 + $0x188] sm:$0xff]   ;;  %v1976_v49 = vld [vmem:[%s2558_s1 + $0x190] sm:$0xff]   ;;  %v1978_v51 = vld [vmem:[%s2558_s1 + $0x1d8] sm:$0xff]  }
  0x11   :  { %1751 = vmatpush3.bf16.msra.mxu1 %v1944_v15  ;;  %1730 = vmatprep.subr.bf16.mxu0 %v1945_v16  ;;  %v1979_v52 = vld [vmem:[%s2558_s1 + $0x118] sm:$0xff]   ;;  %v1981_v54 = vld [vmem:[%s2558_s1 + $0x160] sm:$0xff]   ;;  %v1985_v58 = vld [vmem:[%s2558_s1 + $0x168] sm:$0xff]  }
  0x12   :  { %1752 = vmatprep.subr.bf16.mxu1 %v1946_v17  ;;  %v1980_v53 = vld [vmem:[%s2558_s1 + $0x198] sm:$0xff]   ;;  %v1982_v55 = vld [vmem:[%s2558_s1 + $0x1e0] sm:$0xff]   ;;  %v1986_v59 = vld [vmem:[%s2558_s1 + $0x1e8] sm:$0xff]  }
  0x13   :  { %v1983_v56 = vld [vmem:[%s2558_s1 + $0x120] sm:$0xff]   ;;  %v1987_v60 = vld [vmem:[%s2558_s1 + $0x128] sm:$0xff]   ;;  %v1989_v62 = vld [vmem:[%s2558_s1 + $0x170] sm:$0xff]  }
  0x14   :  { %1731 = vmatpush3.bf16.msra.mxu0 %v1947_v18  ;;  %v1984_v57 = vld [vmem:[%s2558_s1 + $0x1a0] sm:$0xff]   ;;  %v1988_v61 = vld [vmem:[%s2558_s1 + $0x1a8] sm:$0xff]   ;;  %v1990_v63 = vld [vmem:[%s2558_s1 + $0x1f0] sm:$0xff]  }
  0x15   :  { %1753 = vmatpush3.bf16.msra.mxu1 %v1948_v19  ;;  %1732 = vmatprep.subr.bf16.mxu0 %v1949_v20  ;;  %v1991_v0 = vld [vmem:[%s2558_s1 + $0x130] sm:$0xff]   ;;  %v1993_v2 = vld [vmem:[%s2558_s1 + $0x178] sm:$0xff]   ;;  %v2001_v12 = vld [vmem:[%s2558_s1 + $0x240] sm:$0xff]  }
  0x16   :  { %1754 = vmatprep.subr.bf16.mxu1 %v1950_v21  ;;  %v1992_v1 = vld [vmem:[%s2558_s1 + $0x1b0] sm:$0xff]   ;;  %v1994_v3 = vld [vmem:[%s2558_s1 + $0x1f8] sm:$0xff]   ;;  %v2002_v13 = vld [vmem:[%s2558_s1 + $0x2c0] sm:$0xff]  }
  0x17   :  { %v1995_v4 = vld [vmem:[%s2558_s1 + $0x138] sm:$0xff]   ;;  %v23_v6 = vld [vmem:[%s2559_s0 + $0x10] sm:$0xff]  ;;  %v2003_v14 = vld [vmem:[%s2558_s1 + $0x200] sm:$0xff]  }
  0x18   :  { %1733 = vmatpush3.bf16.msra.mxu0 %v1951_v22  ;;  %v1996_v5 = vld [vmem:[%s2558_s1 + $0x1b8] sm:$0xff]   ;;  %v1573_v7 = vcombine.low %v23_v6, %v23_v6  ;;  %v1574_v8 = vcombine.high %v23_v6, %v23_v6  ;;  %v2004_v15 = vld [vmem:[%s2558_s1 + $0x280] sm:$0xff]   ;;  %v2005_v16 = vld [vmem:[%s2558_s1 + $0x248] sm:$0xff]  }
  0x19   :  { %1755 = vmatpush3.bf16.msra.mxu1 %v1952_v23  ;;  %1734 = vmatprep.subr.bf16.mxu0 %v1953_v24  ;;  %v24_v9 = vld [vmem:[%s2559_s0 + $0x18] sm:$0xff]  ;;  %v2006_v17 = vld [vmem:[%s2558_s1 + $0x2c8] sm:$0xff]   ;;  %v2009_v20 = vld [vmem:[%s2558_s1 + $0x250] sm:$0xff]  }
  0x1a   :  { %1756 = vmatprep.subr.bf16.mxu1 %v1954_v25  ;;  %v1575_v10 = vcombine.low %v24_v9, %v24_v9  ;;  %v1576_v11 = vcombine.high %v24_v9, %v24_v9  ;;  %v2007_v18 = vld [vmem:[%s2558_s1 + $0x208] sm:$0xff]   ;;  %v2010_v21 = vld [vmem:[%s2558_s1 + $0x2d0] sm:$0xff]   ;;  %v2013_v24 = vld [vmem:[%s2558_s1 + $0x258] sm:$0xff]  }
  0x1b   :  { %v2008_v19 = vld [vmem:[%s2558_s1 + $0x288] sm:$0xff]   ;;  %v2011_v22 = vld [vmem:[%s2558_s1 + $0x210] sm:$0xff]   ;;  %v2014_v25 = vld [vmem:[%s2558_s1 + $0x2d8] sm:$0xff]  }
  0x1c   :  { %1735 = vmatpush3.bf16.msra.mxu0 %v1955_v26  ;;  %v2012_v23 = vld [vmem:[%s2558_s1 + $0x290] sm:$0xff]   ;;  %v2015_v26 = vld [vmem:[%s2558_s1 + $0x218] sm:$0xff]   ;;  %v2021_v32 = vld [vmem:[%s2558_s1 + $0x268] sm:$0xff]  }
  0x1d   :  { %1757 = vmatpush3.bf16.msra.mxu1 %v1956_v27  ;;  %1736 = vmatprep.subr.bf16.mxu0 %v1957_v28  ;;  %v2016_v27 = vld [vmem:[%s2558_s1 + $0x298] sm:$0xff]   ;;  %v2017_v28 = vld [vmem:[%s2558_s1 + $0x260] sm:$0xff]   ;;  %v2022_v33 = vld [vmem:[%s2558_s1 + $0x2e8] sm:$0xff]  }
  0x1e   :  { %1758 = vmatprep.subr.bf16.mxu1 %v1958_v29  ;;  %v2018_v29 = vld [vmem:[%s2558_s1 + $0x2e0] sm:$0xff]   ;;  %v2024_v35 = vld [vmem:[%s2558_s1 + $0x2a8] sm:$0xff]   ;;  %v2026_v37 = vld [vmem:[%s2558_s1 + $0x2f0] sm:$0xff]  }
  0x1f   :  { %v2057_v6 = vld [vmem:[%s2558_s1 + $0x368] sm:$0xff]  }
  0x20   :  { %1737 = vmatpush3.bf16.msra.mxu0 %v1959_v30  ;;  %v2019_v30 = vld [vmem:[%s2558_s1 + $0x220] sm:$0xff]   ;;  %v2060_v9 = vld [vmem:[%s2558_s1 + $0x3a8] sm:$0xff]  }
  0x21   :  { %1759 = vmatpush3.bf16.msra.mxu1 %v1960_v31  ;;  %1766 = vmatprep.subr.bf16.mxu0 %v1965_v38  ;;  %v2020_v31 = vld [vmem:[%s2558_s1 + $0x2a0] sm:$0xff]   ;;  %v2027_v38 = vld [vmem:[%s2558_s1 + $0x230] sm:$0xff]  }
  0x22   :  { %1788 = vmatprep.subr.bf16.mxu1 %v1966_v39  ;;  %v2028_v39 = vld [vmem:[%s2558_s1 + $0x2b0] sm:$0xff]  }
  0x23   :  { %1149 = vmatmul.mubr.bf16.vlgmr.msra.gmra.mrb[0].mxu0 %v1569_v34  ;;  %v2023_v34 = vld [vmem:[%s2558_s1 + $0x228] sm:$0xff]  }
  0x24   :  { %1189 = vmatmul.mubr.bf16.vlgmr.msra.gmra.mrb[0].mxu1 %v1571_v36  ;;  %1767 = vmatpush3.bf16.msra.mxu0 %v1967_v40  ;;  %v2025_v36 = vld [vmem:[%s2558_s1 + $0x270] sm:$0xff]   ;;  %v2029_v40 = vld [vmem:[%s2558_s1 + $0x278] sm:$0xff]  }
  0x25   :  { %1789 = vmatpush3.bf16.msra.mxu1 %v1968_v41  ;;  %1768 = vmatprep.subr.bf16.mxu0 %v1969_v42  ;;  %v2030_v41 = vld [vmem:[%s2558_s1 + $0x2f8] sm:$0xff]  }
  0x26   :  { %1790 = vmatprep.subr.bf16.mxu1 %v1970_v43  ;;  %1228 = vmatprep.mubr.bf16.mxu0 %v1574_v8  ;;  %v2031_v42 = vld [vmem:[%s2558_s1 + $0x238] sm:$0xff]   ;;  %v2059_v8 = vld [vmem:[%s2558_s1 + $0x328] sm:$0xff]  }
  0x27   :  { %1268 = vmatprep.mubr.bf16.mxu1 %v1576_v11  ;;  %v2032_v43 = vld [vmem:[%s2558_s1 + $0x2b8] sm:$0xff]   ;;  %v2062_v11 = vld [vmem:[%s2558_s1 + $0x3f0] sm:$0xff]  }
  0x28   :  { %1769 = vmatpush3.bf16.msra.mxu0 %v1971_v44  ;;  %v25_v44 = vld [vmem:[%s2559_s0 + $0x20] sm:$0xff] }
  0x29   :  { %1791 = vmatpush3.bf16.msra.mxu1 %v1972_v45  ;;  %1770 = vmatprep.subr.bf16.mxu0 %v1973_v46  ;;  %v26_v45 = vld [vmem:[%s2559_s0 + $0x28] sm:$0xff]  ;;  %v1577_v46 = vcombine.low %v25_v44, %v25_v44 }
  0x2a   :  { %1792 = vmatprep.subr.bf16.mxu1 %v1974_v47  ;;  %v1578_v47 = vcombine.high %v25_v44, %v25_v44 }
  0x2c   :  { %1771 = vmatpush3.bf16.msra.mxu0 %v1975_v48  ;;  %v1579_v48 = vcombine.low %v26_v45, %v26_v45 }
  0x2d   :  { %1793 = vmatpush3.bf16.msra.mxu1 %v1976_v49  ;;  %1772 = vmatprep.subr.bf16.mxu0 %v1977_v50  ;;  %v1580_v49 = vcombine.high %v26_v45, %v26_v45  ;;  %v2037_v50 = vld [vmem:[%s2558_s1 + $0x340] sm:$0xff]  }
  0x2e   :  { %1794 = vmatprep.subr.bf16.mxu1 %v1978_v51  ;;  %v2038_v51 = vld [vmem:[%s2558_s1 + $0x3c0] sm:$0xff]  }
  0x30   :  { %1773 = vmatpush3.bf16.msra.mxu0 %v1979_v52  ;;  %v2039_v52 = vld [vmem:[%s2558_s1 + $0x300] sm:$0xff]  }
  0x31   :  { %1795 = vmatpush3.bf16.msra.mxu1 %v1980_v53  ;;  %1774 = vmatprep.subr.bf16.mxu0 %v1981_v54  ;;  %v2040_v53 = vld [vmem:[%s2558_s1 + $0x380] sm:$0xff]   ;;  %v2041_v54 = vld [vmem:[%s2558_s1 + $0x348] sm:$0xff]  }
  0x32   :  { %1796 = vmatprep.subr.bf16.mxu1 %v1982_v55  ;;  %v2042_v55 = vld [vmem:[%s2558_s1 + $0x3c8] sm:$0xff]  }
  0x34   :  { %1775 = vmatpush3.bf16.msra.mxu0 %v1983_v56  ;;  %v2043_v56 = vld [vmem:[%s2558_s1 + $0x308] sm:$0xff]  }
  0x35   :  { %1797 = vmatpush3.bf16.msra.mxu1 %v1984_v57  ;;  %1776 = vmatprep.subr.bf16.mxu0 %v1985_v58  ;;  %v2044_v57 = vld [vmem:[%s2558_s1 + $0x388] sm:$0xff]   ;;  %v2045_v58 = vld [vmem:[%s2558_s1 + $0x350] sm:$0xff]  }
  0x36   :  { %1798 = vmatprep.subr.bf16.mxu1 %v1986_v59  ;;  %v2046_v59 = vld [vmem:[%s2558_s1 + $0x3d0] sm:$0xff]  }
  0x38   :  { %1777 = vmatpush3.bf16.msra.mxu0 %v1987_v60  ;;  %v2047_v60 = vld [vmem:[%s2558_s1 + $0x310] sm:$0xff]  }
  0x39   :  { %1799 = vmatpush3.bf16.msra.mxu1 %v1988_v61  ;;  %1778 = vmatprep.subr.bf16.mxu0 %v1989_v62  ;;  %v2048_v61 = vld [vmem:[%s2558_s1 + $0x390] sm:$0xff]   ;;  %v2049_v62 = vld [vmem:[%s2558_s1 + $0x358] sm:$0xff]  }
  0x3a   :  { %1800 = vmatprep.subr.bf16.mxu1 %v1990_v63  ;;  %v2050_v63 = vld [vmem:[%s2558_s1 + $0x3d8] sm:$0xff]  }
  0x3c   :  { %1779 = vmatpush3.bf16.msra.mxu0 %v1991_v0  ;;  %v2051_v0 = vld [vmem:[%s2558_s1 + $0x318] sm:$0xff]  }
  0x3d   :  { %1801 = vmatpush3.bf16.msra.mxu1 %v1992_v1  ;;  %1780 = vmatprep.subr.bf16.mxu0 %v1993_v2  ;;  %v2052_v1 = vld [vmem:[%s2558_s1 + $0x398] sm:$0xff]   ;;  %v2053_v2 = vld [vmem:[%s2558_s1 + $0x360] sm:$0xff]  }
  0x3e   :  { %1802 = vmatprep.subr.bf16.mxu1 %v1994_v3  ;;  %v2054_v3 = vld [vmem:[%s2558_s1 + $0x3e0] sm:$0xff]  }
  0x40   :  { %1781 = vmatpush3.bf16.msra.mxu0 %v1995_v4  ;;  %v2055_v4 = vld [vmem:[%s2558_s1 + $0x320] sm:$0xff]  }
  0x41   :  { %1803 = vmatpush3.bf16.msra.mxu1 %v1996_v5  ;;  %1810 = vmatprep.subr.bf16.mxu0 %v2001_v12  ;;  %v2056_v5 = vld [vmem:[%s2558_s1 + $0x3a0] sm:$0xff]   ;;  %v2063_v12 = vld [vmem:[%s2558_s1 + $0x330] sm:$0xff]  }
  0x42   :  { %1832 = vmatprep.subr.bf16.mxu1 %v2002_v13  ;;  %v2064_v13 = vld [vmem:[%s2558_s1 + $0x3b0] sm:$0xff]  }
  0x43   :  { %1229 = vmatmul.mubr.bf16.vlgmr.msra.gmra.mrb[4].mxu0 %v1573_v7  ;;  %v2058_v7 = vld [vmem:[%s2558_s1 + $0x3e8] sm:$0xff]  }
  0x44   :  { %1269 = vmatmul.mubr.bf16.vlgmr.msra.gmra.mrb[4].mxu1 %v1575_v10  ;;  %1811 = vmatpush3.bf16.msra.mxu0 %v2003_v14  ;;  %v2061_v10 = vld [vmem:[%s2558_s1 + $0x370] sm:$0xff]   ;;  %v2065_v14 = vld [vmem:[%s2558_s1 + $0x378] sm:$0xff]  }
  0x45   :  { %1833 = vmatpush3.bf16.msra.mxu1 %v2004_v15  ;;  %1812 = vmatprep.subr.bf16.mxu0 %v2005_v16  ;;  %v2066_v15 = vld [vmem:[%s2558_s1 + $0x3f8] sm:$0xff]  }
  0x46   :  { %1834 = vmatprep.subr.bf16.mxu1 %v2006_v17  ;;  %1308 = vmatprep.mubr.bf16.mxu0 %v1578_v47  ;;  %v2067_v16 = vld [vmem:[%s2558_s1 + $0x338] sm:$0xff]  }
  0x47   :  { %1348 = vmatprep.mubr.bf16.mxu1 %v1580_v49  ;;  %v2068_v17 = vld [vmem:[%s2558_s1 + $0x3b8] sm:$0xff]  }
  0x48   :  { %1813 = vmatpush3.bf16.msra.mxu0 %v2007_v18  ;;  %v27_v18 = vld [vmem:[%s2559_s0 + $0x30] sm:$0xff] }
  0x49   :  { %1835 = vmatpush3.bf16.msra.mxu1 %v2008_v19  ;;  %1814 = vmatprep.subr.bf16.mxu0 %v2009_v20  ;;  %v28_v19 = vld [vmem:[%s2559_s0 + $0x38] sm:$0xff]  ;;  %v1581_v20 = vcombine.low %v27_v18, %v27_v18 }
  0x4a   :  { %1836 = vmatprep.subr.bf16.mxu1 %v2010_v21  ;;  %v1582_v21 = vcombine.high %v27_v18, %v27_v18 }
  0x4c   :  { %1815 = vmatpush3.bf16.msra.mxu0 %v2011_v22  ;;  %v1583_v22 = vcombine.low %v28_v19, %v28_v19 }
  0x4d   :  { %1837 = vmatpush3.bf16.msra.mxu1 %v2012_v23  ;;  %1816 = vmatprep.subr.bf16.mxu0 %v2013_v24  ;;  %v1584_v23 = vcombine.high %v28_v19, %v28_v19  ;;  %v2085_v24 = vmov 0.0  }
  0x4e   :  { %1838 = vmatprep.subr.bf16.mxu1 %v2014_v25  ;;  %v2073_v25 = vld [vmem:[%s2560_s3] sm:$0xff]  }
  0x50   :  { %1817 = vmatpush3.bf16.msra.mxu0 %v2015_v26  ;;  %v2074_v26 = vld [vmem:[%s2560_s3 + $0x8] sm:$0xff]  }
  0x51   :  { %1839 = vmatpush3.bf16.msra.mxu1 %v2016_v27  ;;  %1818 = vmatprep.subr.bf16.mxu0 %v2017_v28  ;;  %v2075_v27 = vld [vmem:[%s2560_s3 + $0x10] sm:$0xff]   ;;  %v2076_v28 = vld [vmem:[%s2560_s3 + $0x18] sm:$0xff]  }
  0x52   :  { %1840 = vmatprep.subr.bf16.mxu1 %v2018_v29  ;;  %v2077_v29 = vld [vmem:[%s2560_s3 + $0x20] sm:$0xff]  }
  0x54   :  { %1819 = vmatpush3.bf16.msra.mxu0 %v2019_v30  ;;  %v2078_v30 = vld [vmem:[%s2560_s3 + $0x28] sm:$0xff]  }
  0x55   :  { %1841 = vmatpush3.bf16.msra.mxu1 %v2020_v31  ;;  %1820 = vmatprep.subr.bf16.mxu0 %v2021_v32  ;;  %v2079_v31 = vld [vmem:[%s2560_s3 + $0x30] sm:$0xff]   ;;  %v2080_v32 = vld [vmem:[%s2560_s3 + $0x38] sm:$0xff]  }
  0x56   :  { %1842 = vmatprep.subr.bf16.mxu1 %v2022_v33 }
  0x58   :  { %1821 = vmatpush3.bf16.msra.mxu0 %v2023_v34 }
  0x59   :  { %1843 = vmatpush3.bf16.msra.mxu1 %v2024_v35  ;;  %1822 = vmatprep.subr.bf16.mxu0 %v2025_v36  ;;  %v1568_v35 = vld [vmem:[%s2561_s2] ss:$0 sm:$0xff] }
  0x5a   :  { %1844 = vmatprep.subr.bf16.mxu1 %v2026_v37 }
  0x5c   :  { %1823 = vmatpush3.bf16.msra.mxu0 %v2027_v38 }
  0x5d   :  { %1845 = vmatpush3.bf16.msra.mxu1 %v2028_v39  ;;  %1824 = vmatprep.subr.bf16.mxu0 %v2029_v40 }
  0x5e   :  { %1846 = vmatprep.subr.bf16.mxu1 %v2030_v41 }
  0x60   :  { %1825 = vmatpush3.bf16.msra.mxu0 %v2031_v42 }
  0x61   :  { %1847 = vmatpush3.bf16.msra.mxu1 %v2032_v43  ;;  %1854 = vmatprep.subr.bf16.mxu0 %v2037_v50 }
  0x62   :  { %1876 = vmatprep.subr.bf16.mxu1 %v2038_v51 }
  0x63   :  { %1309 = vmatmul.mubr.bf16.vlgmr.msra.gmra.mrb[8].mxu0 %v1577_v46 }
  0x64   :  { %1349 = vmatmul.mubr.bf16.vlgmr.msra.gmra.mrb[8].mxu1 %v1579_v48  ;;  %1855 = vmatpush3.bf16.msra.mxu0 %v2039_v52 }
  0x65   :  { %1877 = vmatpush3.bf16.msra.mxu1 %v2040_v53  ;;  %1856 = vmatprep.subr.bf16.mxu0 %v2041_v54 }
  0x66   :  { %1878 = vmatprep.subr.bf16.mxu1 %v2042_v55  ;;  %1388 = vmatprep.mubr.bf16.mxu0 %v1582_v21 }
  0x67   :  { %1428 = vmatprep.mubr.bf16.mxu1 %v1584_v23 }
  0x68   :  { %1857 = vmatpush3.bf16.msra.mxu0 %v2043_v56 }
  0x69   :  { %1879 = vmatpush3.bf16.msra.mxu1 %v2044_v57  ;;  %1858 = vmatprep.subr.bf16.mxu0 %v2045_v58 }
  0x6a   :  { %1880 = vmatprep.subr.bf16.mxu1 %v2046_v59 }
  0x6c   :  { %1859 = vmatpush3.bf16.msra.mxu0 %v2047_v60 }
  0x6d   :  { %1881 = vmatpush3.bf16.msra.mxu1 %v2048_v61  ;;  %1860 = vmatprep.subr.bf16.mxu0 %v2049_v62 }
  0x6e   :  { %1882 = vmatprep.subr.bf16.mxu1 %v2050_v63 }
  0x70   :  { %1861 = vmatpush3.bf16.msra.mxu0 %v2051_v0 }
  0x71   :  { %1883 = vmatpush3.bf16.msra.mxu1 %v2052_v1  ;;  %1862 = vmatprep.subr.bf16.mxu0 %v2053_v2 }
  0x72   :  { %1884 = vmatprep.subr.bf16.mxu1 %v2054_v3 }
  0x74   :  { %1863 = vmatpush3.bf16.msra.mxu0 %v2055_v4 }
  0x75   :  { %1885 = vmatpush3.bf16.msra.mxu1 %v2056_v5  ;;  %1864 = vmatprep.subr.bf16.mxu0 %v2057_v6 }
  0x76   :  { %1886 = vmatprep.subr.bf16.mxu1 %v2058_v7 }
  0x78   :  { %1865 = vmatpush3.bf16.msra.mxu0 %v2059_v8 }
  0x79   :  { %1887 = vmatpush3.bf16.msra.mxu1 %v2060_v9  ;;  %1866 = vmatprep.subr.bf16.mxu0 %v2061_v10 }
  0x7a   :  { %1888 = vmatprep.subr.bf16.mxu1 %v2062_v11 }
  0x7c   :  { %1867 = vmatpush3.bf16.msra.mxu0 %v2063_v12 }
  0x7d   :  { %1889 = vmatpush3.bf16.msra.mxu1 %v2064_v13  ;;  %1868 = vmatprep.subr.bf16.mxu0 %v2065_v14 }
  0x7e   :  { %1890 = vmatprep.subr.bf16.mxu1 %v2066_v15 }
  0x80   :  { %1869 = vmatpush3.bf16.msra.mxu0 %v2067_v16 }
  0x81   :  { %1891 = vmatpush3.bf16.msra.mxu1 %v2068_v17  ;;  %1907 = vmatprep.subr.bf16.mxu0 %v2085_v24 }
  0x83   :  { %1389 = vmatmul.mubr.bf16.vlgmr.msra.gmra.mrb[12].mxu0 %v1581_v20  ;;  %v1549_v20 = vlaneseq }
  0x84   :  { %1429 = vmatmul.mubr.bf16.vlgmr.msra.gmra.mrb[12].mxu1 %v1583_v22  ;;  %1908 = vmatpush3.bf16.msra.mxu0 %v2073_v25  ;;  %v1713_v22 = vld [vmem:[%s2562_s4] ss:$0 sm:$0xff] }
  0x85   :  { %1909 = vmatprep.subr.bf16.mxu0 %v2085_v24  ;;  %1923 = vmatprep.mubr.msk.bf16.mxu0 %vm2086_vm0, %v2085_v24  ;;  %v1550_v21 = vand.u32 127, %v1549_v20 }
  0x87   :  { %vm1551_vm1 = vcmp.lt.s32.totalorder %v1550_v21, 10 }
  0x88   :  { %1910 = vmatpush3.bf16.msra.mxu0 %v2074_v26 }
  0x89   :  { %1911 = vmatprep.subr.bf16.mxu0 %v2085_v24 }
  0x8c   :  { %1912 = vmatpush3.bf16.msra.mxu0 %v2075_v27 }
  0x8d   :  { %1913 = vmatprep.subr.bf16.mxu0 %v2085_v24 }
  0x90   :  { %1914 = vmatpush3.bf16.msra.mxu0 %v2076_v28 }
  0x91   :  { %1915 = vmatprep.subr.bf16.mxu0 %v2085_v24 }
  0x94   :  { %1916 = vmatpush3.bf16.msra.mxu0 %v2077_v29 }
  0x95   :  { %1917 = vmatprep.subr.bf16.mxu0 %v2085_v24 }
  0x98   :  { %1918 = vmatpush3.bf16.msra.mxu0 %v2078_v30 }
  0x99   :  { %1919 = vmatprep.subr.bf16.mxu0 %v2085_v24 }
  0x9c   :  { %1920 = vmatpush3.bf16.msra.mxu0 %v2079_v31 }
  0x9d   :  { %1921 = vmatprep.subr.bf16.mxu0 %v2085_v24 }
  0xa0   :  { %1922 = vmatpush3.bf16.msra.mxu0 %v2080_v32 }
  0xf6   :  { %v1738_v33 = vpop.f32.mrb[0].mxu0 }
  0xf7   :  { %v1760_v34 = vpop.f32.mrb[0].mxu1  ;;  %v1739_v36 = vpop.f32.mrb[1].mxu0 }
  0xf8   :  { %v1761_v37 = vpop.f32.mrb[1].mxu1  ;;  %v1740_v38 = vadd.f32 %v1739_v36, %v1738_v33  ;;  %v1741_v40 = vpop.f32.mrb[2].mxu0 }
  0xf9   :  { %v1762_v39 = vadd.f32 %v1761_v37, %v1760_v34  ;;  %v1763_v41 = vpop.f32.mrb[2].mxu1  ;;  %v1742_v42 = vpop.f32.mrb[3].mxu0 }
  0xfa   :  { %v1764_v43 = vpop.f32.mrb[3].mxu1  ;;  %v1151_v44 = vadd.f32 %v1740_v38, %v1568_v35 }
  0xfc   :  { %v1191_v45 = vadd.f32 %v1762_v39, %v1151_v44 }
 0x116   :  { %v1782_v46 = vpop.f32.mrb[4].mxu0 }
 0x117   :  { %v1804_v47 = vpop.f32.mrb[4].mxu1  ;;  %v1783_v48 = vpop.f32.mrb[5].mxu0 }
 0x118   :  { %v1805_v49 = vpop.f32.mrb[5].mxu1  ;;  %v1784_v50 = vadd.f32 %v1783_v48, %v1782_v46  ;;  %v1785_v52 = vpop.f32.mrb[6].mxu0 }
 0x119   :  { %v1806_v51 = vadd.f32 %v1805_v49, %v1804_v47  ;;  %v1807_v53 = vpop.f32.mrb[6].mxu1  ;;  %v1786_v54 = vpop.f32.mrb[7].mxu0 }
 0x11a   :  { %v1808_v55 = vpop.f32.mrb[7].mxu1  ;;  %v1231_v56 = vadd.f32 %v1784_v50, %v1191_v45 }
 0x11c   :  { %v1271_v57 = vadd.f32 %v1806_v51, %v1231_v56 }
 0x136   :  { %v1826_v58 = vpop.f32.mrb[8].mxu0 }
 0x137   :  { %v1848_v59 = vpop.f32.mrb[8].mxu1  ;;  %v1827_v60 = vpop.f32.mrb[9].mxu0 }
 0x138   :  { %v1828_v61 = vadd.f32 %v1827_v60, %v1826_v58  ;;  %v1849_v62 = vpop.f32.mrb[9].mxu1  ;;  %v1829_v63 = vpop.f32.mrb[10].mxu0 }
 0x139   :  { %v1850_v0 = vadd.f32 %v1849_v62, %v1848_v59  ;;  %v1851_v1 = vpop.f32.mrb[10].mxu1  ;;  %v1830_v2 = vpop.f32.mrb[11].mxu0 }
 0x13a   :  { %v1311_v3 = vadd.f32 %v1828_v61, %v1271_v57  ;;  %v1852_v4 = vpop.f32.mrb[11].mxu1 }
 0x13c   :  { %v1351_v5 = vadd.f32 %v1850_v0, %v1311_v3 }
 0x156   :  { %v1870_v6 = vpop.f32.mrb[12].mxu0 }
 0x157   :  { %v1892_v7 = vpop.f32.mrb[12].mxu1  ;;  %v1871_v8 = vpop.f32.mrb[13].mxu0 }
 0x158   :  { %v1872_v9 = vadd.f32 %v1871_v8, %v1870_v6  ;;  %v1893_v10 = vpop.f32.mrb[13].mxu1  ;;  %v1873_v11 = vpop.f32.mrb[14].mxu0 }
 0x159   :  { %v1894_v12 = vadd.f32 %v1893_v10, %v1892_v7  ;;  %v1895_v13 = vpop.f32.mrb[14].mxu1  ;;  %v1874_v14 = vpop.f32.mrb[15].mxu0 }
 0x15a   :  { %v1391_v15 = vadd.f32 %v1872_v9, %v1351_v5  ;;  %v1896_v16 = vpop.f32.mrb[15].mxu1 }
 0x15c   :  { %v1431_v17 = vadd.f32 %v1894_v12, %v1391_v15 }
 0x15e   :  { %v1436_v18 = vmax.f32 %v1431_v17, 0.0 }
 0x160   :  { %v1437_v19 = vpack.c.bf16 %v1436_v18, %v1436_v18 }
 0x162   :  { %1924 = vmatmul.mubr.bf16.vlgmr.msra.gmra.mrb[16].mxu0 %v1437_v19 }
 0x235   :  { %v1543_v23 = vpop.f32.mrb[16].mxu0 }
 0x236   :  { %v1544_v24 = vadd.f32 %v1713_v22, %v1543_v23  ;;  %v1925_v25 = vpop.f32.mrb[17].mxu0 }
 0x237   :  { %v1546_v26 = vpop.f32.mrb[18].mxu0 }
 0x238   :  { %v1926_v27 = vpop.f32.mrb[19].mxu0  ;;  %v1552_v28 = vsel %vm1551_vm1, %v1544_v24, -1e+30 }
 0x239   :  { %1553 = vmax.xlane.f32.xlu0 %v1552_v28 }
 0x2c6   :  { %v1554_v29 = vpop.xlane.xlu0 %1553 }
 0x2c7   :  { %v1555_v30 = vsub.f32 %v1552_v28, %v1554_v29 }
 0x2c9   :  { %v1556_v31 = vmul.f32 1.442695, %v1555_v30 }
 0x2cb   :  { %2081 = vpow2.f32 %v1556_v31 }
 0x2d5   :  { %v2082_v32 = vpop.eup %2081 }
 0x2d6   :  { %1558 = vadd.xlane.f32.xlu0 %v2082_v32 }
 0x363   :  { %v1559_v33 = vpop.xlane.xlu0 %1558 }
 0x364   :  { %2083 = vlog2.f32 %v1559_v33 }
 0x36e   :  { %v2084_v34 = vpop.eup %2083 }
 0x36f   :  { %v1561_v35 = vmul.f32 0.6931472, %v2084_v34 }
 0x371   :  { %v1562_v36 = vsub.f32 %v1555_v30, %v1561_v35 }
 0x373   :  { %1563 = vst [vmem:[%s2563_s5] sm:$0xff] %v1562_v36 }

</bundles_post_ra>
